<compile_context>
chip_gen: v5e
topology: v5e:2x2
jax: 0.10.0
libtpu: 0.0.40
codegen_flags: <defaults>
</compile_context>

<pallas_src>
import functools

import jax
import jax.numpy as jnp
from jax import lax
from jax.experimental import pallas as pl
from jax.experimental.pallas import tpu as pltpu

LANE = 128
SUBLANE = 8


def _round_up(x, m):
    return (x + m - 1) // m * m


# ----------------------------------------------------------------------------- kernel


def _cnn_kernel(L_pad, T_pad, max_fs,
                ids_ref, table_ref, w_ref, mask_ref, fcw_ref, fcb_ref, out_ref):
    """Fused: embed -> conv(all filter sizes) -> +bias/mask -> max-over-time -> ReLU -> FC.

    ids_ref:   [TB*T_pad, 1]      int32  token ids (pad id is out-of-range -> zero row)
    table_ref: [V_pad, D]         bf16   embedding table (zero-padded rows)
    w_ref:     [max_fs*D, N_pad]  bf16   all conv filters packed along N (zero-padded)
    mask_ref:  [L_pad, N_pad]     f32    additive bias+mask: b[n] if t < limit[n] else -1e30
    fcw_ref:   [N_pad, OUT_pad]   f32    fc weight (zero-padded)
    fcb_ref:   [1, OUT_pad]       f32    fc bias   (zero-padded)
    out_ref:   [TB, OUT_pad]      f32
    """
    v_pad, emb_dim = table_ref.shape
    n_pad = w_ref.shape[-1]
    rows = ids_ref.shape[0]
    tb = rows // T_pad

    # --- Fused embedding gather: one-hot(ids) @ table on the MXU (table resident in VMEM).
    ids = ids_ref[...]                                               # [rows, 1] int32
    vocab_iota = lax.broadcasted_iota(jnp.int32, (rows, v_pad), 1)
    onehot = jnp.where(vocab_iota == ids, 1.0, 0.0).astype(jnp.bfloat16)
    emb = jnp.dot(onehot, table_ref[...], preferred_element_type=jnp.float32)
    emb = emb.astype(jnp.bfloat16).reshape(tb, T_pad, emb_dim)       # [TB, T_pad, D]

    # --- Convolutions for every filter size at once: max_fs shifted matmuls against the
    #     packed weight slab (bf16 operands, f32 accumulation).  No HBM im2col.
    acc = jnp.zeros((tb * L_pad, n_pad), jnp.float32)
    for i in range(max_fs):
        win = emb[:, i:i + L_pad, :].reshape(tb * L_pad, emb_dim)
        acc = acc + jnp.dot(win, w_ref[i * emb_dim:(i + 1) * emb_dim, :],
                            preferred_element_type=jnp.float32)

    # --- Precomputed additive bias+mask, max over time, ReLU after the max (equivalent
    #     because ReLU is monotone; fully-masked pad columns give relu(-1e30) = 0).
    act = acc.reshape(tb, L_pad, n_pad) + mask_ref[...]
    pooled = jnp.maximum(jnp.max(act, axis=1), 0.0)                  # [TB, N_pad]

    # --- Dropout is identity at inference.  Final FC in f32 (tiny).
    out_ref[...] = jnp.dot(pooled, fcw_ref[...],
                           preferred_element_type=jnp.float32) + fcb_ref[...]


# --------------------------------------------------------------------- one-time packing


def pack_params(params, filter_sizes, seq_len):
    """Pack weights / masks once (hoisted out of the per-forward path)."""
    emb_table = params["embedding"]                       # [V, D] f32
    V, D = emb_table.shape
    fss = tuple(filter_sizes)
    max_fs, min_fs = max(fss), min(fss)
    F = params[f"conv{fss[0]}_w"].shape[-1]
    out_dim = params["fc_b"].shape[-1]
    T = seq_len

    L_pad = _round_up(T - min_fs + 1, SUBLANE)            # padded max-over-time length
    T_pad = L_pad + max_fs - 1                            # padded time so windows fit
    N_pad = _round_up(len(fss) * F, LANE)
    OUT_pad = _round_up(out_dim, LANE)
    V_pad = _round_up(V + 1, SUBLANE)                     # +1: pad token id V hits a zero row

    table = (jnp.zeros((V_pad, D), jnp.float32)
             .at[:V].set(emb_table).astype(jnp.bfloat16))

    K = max_fs * D
    w_all = jnp.zeros((K, N_pad), jnp.float32)
    bias = jnp.zeros((N_pad,), jnp.float32)
    limits = jnp.zeros((N_pad,), jnp.int32)
    for j, fs in enumerate(fss):
        w = params[f"conv{fs}_w"].reshape(fs * D, F)
        w_all = w_all.at[:fs * D, j * F:(j + 1) * F].set(w)
        bias = bias.at[j * F:(j + 1) * F].set(params[f"conv{fs}_b"].reshape(-1))
        limits = limits.at[j * F:(j + 1) * F].set(T - fs + 1)
    w_all = w_all.astype(jnp.bfloat16)

    # Additive bias+mask, precomputed once (grid-invariant): b[n] where valid, -1e30 otherwise.
    t_idx = jnp.arange(L_pad, dtype=jnp.int32)[:, None]
    mask_bias = jnp.where(t_idx < limits[None, :], bias[None, :], -1e30).astype(jnp.float32)

    fcw = (jnp.zeros((N_pad, OUT_pad), jnp.float32)
           .at[:len(fss) * F, :out_dim].set(params["fc_w"]))
    fcb = jnp.zeros((1, OUT_pad), jnp.float32).at[:, :out_dim].set(params["fc_b"])

    dims = dict(T=T, T_pad=T_pad, L_pad=L_pad, D=D, V=V, V_pad=V_pad, max_fs=max_fs,
                N_pad=N_pad, OUT_pad=OUT_pad, out_dim=out_dim)
    return dict(table=table, w_all=w_all, mask_bias=mask_bias, fcw=fcw, fcb=fcb, dims=dims)


# ------------------------------------------------------------------------------ forward


def make_cnn_forward(packed, batch_tile_max=64):
    """Returns a jitted forward(tokens [seq_len, B] int32) -> [B, out_dim] f32."""
    d = packed["dims"]
    table, w_all, mask_bias = packed["table"], packed["w_all"], packed["mask_bias"]
    fcw, fcb = packed["fcw"], packed["fcb"]
    T, T_pad, L_pad, max_fs = d["T"], d["T_pad"], d["L_pad"], d["max_fs"]
    OUT_pad, out_dim, V = d["OUT_pad"], d["out_dim"], d["V"]

    kernel = functools.partial(_cnn_kernel, L_pad, T_pad, max_fs)

    @jax.jit
    def forward(tokens):
        assert tokens.shape[0] == T, "sequence length fixed at pack time"
        ids = tokens.T.astype(jnp.int32)                  # permute(1,0) -> [B, T]
        B = ids.shape[0]

        # Batch tile: multiple of 8 (sublane), >= 2 even grid steps (v7x dual-TC sharding),
        # capped so the per-step working set stays a few MiB.  Pad batch -> no OOB blocks.
        tb = min(batch_tile_max, _round_up(pl.cdiv(B, 2), SUBLANE))
        n_steps = _round_up(pl.cdiv(B, tb), 2)
        B_pad = tb * n_steps

        pad_id = V                                        # out-of-range -> zero embedding row
        ids_p = jnp.full((B_pad, T_pad), pad_id, jnp.int32).at[:B, :T].set(ids)
        ids_col = ids_p.reshape(B_pad * T_pad, 1)         # column layout: no in-kernel relayout

        out_padded = pl.pallas_call(
            kernel,
            out_shape=jax.ShapeDtypeStruct((B_pad, OUT_pad), jnp.float32),
            grid_spec=pltpu.PrefetchScalarGridSpec(
                num_scalar_prefetch=0,
                grid=(n_steps,),
                in_specs=[
                    pl.BlockSpec((tb * T_pad, 1), lambda i: (i, 0)),   # token ids
                    pl.BlockSpec(table.shape, lambda i: (0, 0)),       # embedding table
                    pl.BlockSpec(w_all.shape, lambda i: (0, 0)),       # packed conv weights
                    pl.BlockSpec(mask_bias.shape, lambda i: (0, 0)),   # additive bias+mask
                    pl.BlockSpec(fcw.shape, lambda i: (0, 0)),         # fc weight (f32)
                    pl.BlockSpec(fcb.shape, lambda i: (0, 0)),         # fc bias
                ],
                out_specs=pl.BlockSpec((tb, OUT_pad), lambda i: (i, 0)),
            ),
            compiler_params=pltpu.CompilerParams(
                dimension_semantics=("parallel",),
                vmem_limit_bytes=32 * 1024 * 1024,        # <= physical on v5e/v6e/v7x
            ),
        )(ids_col, table, w_all, mask_bias, fcw, fcb)
        return out_padded[:B, :out_dim]

    return forward


# --------------------------------------------------------------------------- references


def init_params(key, vocab_size, embedding_dim, n_filters, filter_sizes, output_dim):
    keys = jax.random.split(key, 2 * len(filter_sizes) + 3)
    params = {
        "embedding": 0.1 * jax.random.normal(
            keys[0], (vocab_size, embedding_dim), jnp.float32)
    }
    for j, fs in enumerate(filter_sizes):
        params[f"conv{fs}_w"] = 0.1 * jax.random.normal(
            keys[1 + 2 * j], (fs, embedding_dim, n_filters), jnp.float32)
        params[f"conv{fs}_b"] = 0.1 * jax.random.normal(
            keys[2 + 2 * j], (1, n_filters), jnp.float32)
    params["fc_w"] = 0.1 * jax.random.normal(
        keys[-2], (len(filter_sizes) * n_filters, output_dim), jnp.float32)
    params["fc_b"] = 0.1 * jax.random.normal(
        keys[-1], (1, output_dim), jnp.float32)
    return params


def reference_forward(tokens, params, filter_sizes):
    """Pure-f32 JAX reference matching the PyTorch forward (eval mode)."""
    x = tokens.T
    emb = params["embedding"][x].astype(jnp.float32)
    T = emb.shape[1]
    pooled = []
    for fs in filter_sizes:
        w = params[f"conv{fs}_w"]
        b = params[f"conv{fs}_b"]
        L = T - fs + 1
        acc = sum(
            jnp.einsum("btd,df->btf", emb[:, i:i + L, :], w[i]) for i in range(fs))
        conv = jax.nn.relu(acc + b)
        pooled.append(jnp.max(conv, axis=1))
    cat = jnp.concatenate(pooled, axis=1)
    return cat @ params["fc_w"] + params["fc_b"]


def golden_from_packed(tokens, packed):
    """Plain-JAX mirror of the kernel math (same bf16 operands) for a tight numeric check."""
    d = packed["dims"]
    T, T_pad, L_pad, max_fs, D = d["T"], d["T_pad"], d["L_pad"], d["max_fs"], d["D"]
    ids = tokens.T
    B = ids.shape[0]
    emb = packed["table"][ids].astype(jnp.float32)                 # bf16 rows, exact
    emb = jnp.pad(emb, ((0, 0), (0, T_pad - T), (0, 0)))
    acc = jnp.zeros((B, L_pad, d["N_pad"]), jnp.float32)
    for i in range(max_fs):
        win = emb[:, i:i + L_pad, :]
        w_i = packed["w_all"][i * D:(i + 1) * D].astype(jnp.float32)
        acc = acc + jnp.einsum("btd,dn->btn", win, w_i)
    act = acc + packed["mask_bias"]
    pooled = jnp.maximum(jnp.max(act, axis=1), 0.0)
    out = pooled @ packed["fcw"] + packed["fcb"]
    return out[:, :d["out_dim"]]


# --------------------------------------------------------------------------------- main


if __name__ == "__main__":
    vocab_size = 50
    embedding_dim = 32
    n_filters = 8
    filter_sizes = (3, 4, 5)
    output_dim = 2
    seq_len, batch = 16, 4

    key = jax.random.PRNGKey(0)
    k_tok, k_par = jax.random.split(key)
    params = init_params(k_par, vocab_size, embedding_dim, n_filters,
                         filter_sizes, output_dim)
    tokens = jax.random.randint(k_tok, (seq_len, batch), 0, vocab_size,
                                dtype=jnp.int32)

    packed = pack_params(params, filter_sizes, seq_len)    # hoisted, once per model
    forward = make_cnn_forward(packed)

    out = forward(tokens)
    jax.block_until_ready(out)
    assert out.shape == (batch, output_dim)

    # Tight check: plain-JAX golden using the identical bf16 operands / packed mask.
    golden = golden_from_packed(tokens, packed)
    assert jnp.allclose(out, golden, atol=1e-3, rtol=1e-3), "mismatch vs bf16-matched golden"

    # Loose check: pure-f32 PyTorch-semantics reference (difference = bf16 operand rounding).
    ref = reference_forward(tokens, params, filter_sizes)
    assert jnp.allclose(out, ref, atol=2e-2, rtol=2e-2), "mismatch vs f32 reference"

    print("KERNEL_OK")
</pallas_src>

<mosaic_0001>
module attributes {stable_mosaic.version = 11 : i64} {
  func.func @_cnn_kernel(%arg0: i32, %arg1: memref<160x1xi32, #tpu.memory_space<vmem>>, %arg2: memref<56x32xbf16, #tpu.memory_space<vmem>>, %arg3: memref<160x128xbf16, #tpu.memory_space<vmem>>, %arg4: memref<16x128xf32, #tpu.memory_space<vmem>>, %arg5: memref<128x128xf32, #tpu.memory_space<vmem>>, %arg6: memref<1x128xf32, #tpu.memory_space<vmem>>, %arg7: memref<8x128xf32, #tpu.memory_space<vmem>>) attributes {dimension_semantics = [#tpu.dimension_semantics<parallel>], iteration_bounds = array<i64: 2>, scalar_prefetch = 0 : i64, scratch_operands = 0 : i64, tpu.core_type = #tpu.core_type<tc>, window_params = [{transform_indices = @transform_0, window_bounds = array<i64: 160, 1>}, {pipeline_mode = #tpu.pipeline_mode<synchronous>, transform_indices = @transform_1, window_bounds = array<i64: 56, 32>}, {pipeline_mode = #tpu.pipeline_mode<synchronous>, transform_indices = @transform_2, window_bounds = array<i64: 160, 128>}, {pipeline_mode = #tpu.pipeline_mode<synchronous>, transform_indices = @transform_3, window_bounds = array<i64: 16, 128>}, {pipeline_mode = #tpu.pipeline_mode<synchronous>, transform_indices = @transform_4, window_bounds = array<i64: 128, 128>}, {pipeline_mode = #tpu.pipeline_mode<synchronous>, transform_indices = @transform_5, window_bounds = array<i64: 1, 128>}, {transform_indices = @transform_6, window_bounds = array<i64: 8, 128>}]} {
    %c0 = arith.constant 0 : index
    %c0_0 = arith.constant 0 : index
    %0 = vector.load %arg1[%c0, %c0_0] : memref<160x1xi32, #tpu.memory_space<vmem>>, vector<160x1xi32>
    %1 = tpu.iota {dimensions = array<i32: 1>} : vector<160x56xi32>
    %2 = vector.broadcast %0 : vector<160x1xi32> to vector<160x56xi32>
    %3 = arith.cmpi eq, %1, %2 : vector<160x56xi32>
    %cst = arith.constant 1.000000e+00 : f32
    %cst_1 = arith.constant 0.000000e+00 : f32
    %4 = vector.broadcast %cst : f32 to vector<160x56xf32>
    %5 = vector.broadcast %cst_1 : f32 to vector<160x56xf32>
    %6 = arith.select %3, %4, %5 : vector<160x56xi1>, vector<160x56xf32>
    %7 = arith.truncf %6 : vector<160x56xf32> to vector<160x56xbf16>
    %c0_2 = arith.constant 0 : index
    %c0_3 = arith.constant 0 : index
    %8 = vector.load %arg2[%c0_2, %c0_3] : memref<56x32xbf16, #tpu.memory_space<vmem>>, vector<56x32xbf16>
    %cst_4 = arith.constant dense<0.000000e+00> : vector<160x32xf32>
    %9 = tpu.matmul %7, %8, %cst_4 {dimension_numbers = #tpu.dot_dimension_numbers<[1], [0], [0], [1], [0, 0, 1, 1], [], []>} : vector<160x56xbf16>, vector<56x32xbf16>, vector<160x32xf32> -> vector<160x32xf32>
    %10 = arith.truncf %9 : vector<160x32xf32> to vector<160x32xbf16>
    %11 = vector.shape_cast %10 : vector<160x32xbf16> to vector<8x20x32xbf16>
    %cst_5 = arith.constant 0.000000e+00 : f32
    %12 = vector.broadcast %cst_5 : f32 to vector<128x128xf32>
    %13 = vector.extract_strided_slice %11 {offsets = [0, 0, 0], sizes = [8, 16, 32], strides = [1, 1, 1]} : vector<8x20x32xbf16> to vector<8x16x32xbf16>
    %14 = vector.shape_cast %13 : vector<8x16x32xbf16> to vector<128x32xbf16>
    %c0_6 = arith.constant 0 : index
    %c0_7 = arith.constant 0 : index
    %15 = vector.load %arg3[%c0_6, %c0_7] : memref<160x128xbf16, #tpu.memory_space<vmem>>, vector<32x128xbf16>
    %cst_8 = arith.constant dense<0.000000e+00> : vector<128x128xf32>
    %16 = tpu.matmul %14, %15, %cst_8 {dimension_numbers = #tpu.dot_dimension_numbers<[1], [0], [0], [1], [0, 0, 1, 1], [], []>} : vector<128x32xbf16>, vector<32x128xbf16>, vector<128x128xf32> -> vector<128x128xf32>
    %17 = arith.addf %12, %16 : vector<128x128xf32>
    %18 = vector.extract_strided_slice %11 {offsets = [0, 1, 0], sizes = [8, 16, 32], strides = [1, 1, 1]} : vector<8x20x32xbf16> to vector<8x16x32xbf16>
    %19 = vector.shape_cast %18 : vector<8x16x32xbf16> to vector<128x32xbf16>
    %c32 = arith.constant 32 : index
    %c0_9 = arith.constant 0 : index
    %20 = vector.load %arg3[%c32, %c0_9] : memref<160x128xbf16, #tpu.memory_space<vmem>>, vector<32x128xbf16>
    %cst_10 = arith.constant dense<0.000000e+00> : vector<128x128xf32>
    %21 = tpu.matmul %19, %20, %cst_10 {dimension_numbers = #tpu.dot_dimension_numbers<[1], [0], [0], [1], [0, 0, 1, 1], [], []>} : vector<128x32xbf16>, vector<32x128xbf16>, vector<128x128xf32> -> vector<128x128xf32>
    %22 = arith.addf %17, %21 : vector<128x128xf32>
    %23 = vector.extract_strided_slice %11 {offsets = [0, 2, 0], sizes = [8, 16, 32], strides = [1, 1, 1]} : vector<8x20x32xbf16> to vector<8x16x32xbf16>
    %24 = vector.shape_cast %23 : vector<8x16x32xbf16> to vector<128x32xbf16>
    %c64 = arith.constant 64 : index
    %c0_11 = arith.constant 0 : index
    %25 = vector.load %arg3[%c64, %c0_11] : memref<160x128xbf16, #tpu.memory_space<vmem>>, vector<32x128xbf16>
    %cst_12 = arith.constant dense<0.000000e+00> : vector<128x128xf32>
    %26 = tpu.matmul %24, %25, %cst_12 {dimension_numbers = #tpu.dot_dimension_numbers<[1], [0], [0], [1], [0, 0, 1, 1], [], []>} : vector<128x32xbf16>, vector<32x128xbf16>, vector<128x128xf32> -> vector<128x128xf32>
    %27 = arith.addf %22, %26 : vector<128x128xf32>
    %28 = vector.extract_strided_slice %11 {offsets = [0, 3, 0], sizes = [8, 16, 32], strides = [1, 1, 1]} : vector<8x20x32xbf16> to vector<8x16x32xbf16>
    %29 = vector.shape_cast %28 : vector<8x16x32xbf16> to vector<128x32xbf16>
    %c96 = arith.constant 96 : index
    %c0_13 = arith.constant 0 : index
    %30 = vector.load %arg3[%c96, %c0_13] : memref<160x128xbf16, #tpu.memory_space<vmem>>, vector<32x128xbf16>
    %cst_14 = arith.constant dense<0.000000e+00> : vector<128x128xf32>
    %31 = tpu.matmul %29, %30, %cst_14 {dimension_numbers = #tpu.dot_dimension_numbers<[1], [0], [0], [1], [0, 0, 1, 1], [], []>} : vector<128x32xbf16>, vector<32x128xbf16>, vector<128x128xf32> -> vector<128x128xf32>
    %32 = arith.addf %27, %31 : vector<128x128xf32>
    %33 = vector.extract_strided_slice %11 {offsets = [0, 4, 0], sizes = [8, 16, 32], strides = [1, 1, 1]} : vector<8x20x32xbf16> to vector<8x16x32xbf16>
    %34 = vector.shape_cast %33 : vector<8x16x32xbf16> to vector<128x32xbf16>
    %c128 = arith.constant 128 : index
    %c0_15 = arith.constant 0 : index
    %35 = vector.load %arg3[%c128, %c0_15] : memref<160x128xbf16, #tpu.memory_space<vmem>>, vector<32x128xbf16>
    %cst_16 = arith.constant dense<0.000000e+00> : vector<128x128xf32>
    %36 = tpu.matmul %34, %35, %cst_16 {dimension_numbers = #tpu.dot_dimension_numbers<[1], [0], [0], [1], [0, 0, 1, 1], [], []>} : vector<128x32xbf16>, vector<32x128xbf16>, vector<128x128xf32> -> vector<128x128xf32>
    %37 = arith.addf %32, %36 : vector<128x128xf32>
    %38 = vector.shape_cast %37 : vector<128x128xf32> to vector<8x16x128xf32>
    %c0_17 = arith.constant 0 : index
    %c0_18 = arith.constant 0 : index
    %39 = vector.load %arg4[%c0_17, %c0_18] : memref<16x128xf32, #tpu.memory_space<vmem>>, vector<16x128xf32>
    %40 = vector.shape_cast %39 : vector<16x128xf32> to vector<1x16x128xf32>
    %41 = vector.broadcast %40 : vector<1x16x128xf32> to vector<8x16x128xf32>
    %42 = arith.addf %38, %41 : vector<8x16x128xf32>
    %cst_19 = arith.constant dense<0xFF800000> : vector<8x128xf32>
    %43 = vector.multi_reduction <maximumf>, %42, %cst_19 [1] : vector<8x16x128xf32> to vector<8x128xf32>
    %cst_20 = arith.constant 0.000000e+00 : f32
    %44 = vector.broadcast %cst_20 : f32 to vector<8x128xf32>
    %45 = arith.maximumf %43, %44 : vector<8x128xf32>
    %c0_21 = arith.constant 0 : index
    %c0_22 = arith.constant 0 : index
    %46 = vector.load %arg5[%c0_21, %c0_22] : memref<128x128xf32, #tpu.memory_space<vmem>>, vector<128x128xf32>
    %cst_23 = arith.constant dense<0.000000e+00> : vector<8x128xf32>
    %47 = tpu.matmul %45, %46, %cst_23 {dimension_numbers = #tpu.dot_dimension_numbers<[1], [0], [0], [1], [0, 0, 1, 1], [], []>} : vector<8x128xf32>, vector<128x128xf32>, vector<8x128xf32> -> vector<8x128xf32>
    %c0_24 = arith.constant 0 : index
    %c0_25 = arith.constant 0 : index
    %48 = vector.load %arg6[%c0_24, %c0_25] : memref<1x128xf32, #tpu.memory_space<vmem>>, vector<1x128xf32>
    %49 = vector.broadcast %48 : vector<1x128xf32> to vector<8x128xf32>
    %50 = arith.addf %47, %49 : vector<8x128xf32>
    %c0_26 = arith.constant 0 : index
    %c0_27 = arith.constant 0 : index
    %51 = vector.load %arg7[%c0_26, %c0_27] : memref<8x128xf32, #tpu.memory_space<vmem>>, vector<8x128xf32>
    tpu.vector_store %arg7[%c0_26, %c0_27], %50 {strides = array<i32>} : memref<8x128xf32, #tpu.memory_space<vmem>>, vector<8x128xf32>,
    return
  }
  func.func @transform_0(%arg0: i32) -> (i32, i32) {
    %c0_i32 = arith.constant 0 : i32
    %c0_i32_0 = arith.constant 0 : i32
    return %arg0, %c0_i32 : i32, i32
  }
  func.func @transform_1(%arg0: i32) -> (i32, i32) {
    %c0_i32 = arith.constant 0 : i32
    %c0_i32_0 = arith.constant 0 : i32
    %c0_i32_1 = arith.constant 0 : i32
    return %c0_i32, %c0_i32_0 : i32, i32
  }
  func.func @transform_2(%arg0: i32) -> (i32, i32) {
    %c0_i32 = arith.constant 0 : i32
    %c0_i32_0 = arith.constant 0 : i32
    %c0_i32_1 = arith.constant 0 : i32
    return %c0_i32, %c0_i32_0 : i32, i32
  }
  func.func @transform_3(%arg0: i32) -> (i32, i32) {
    %c0_i32 = arith.constant 0 : i32
    %c0_i32_0 = arith.constant 0 : i32
    %c0_i32_1 = arith.constant 0 : i32
    return %c0_i32, %c0_i32_0 : i32, i32
  }
  func.func @transform_4(%arg0: i32) -> (i32, i32) {
    %c0_i32 = arith.constant 0 : i32
    %c0_i32_0 = arith.constant 0 : i32
    %c0_i32_1 = arith.constant 0 : i32
    return %c0_i32, %c0_i32_0 : i32, i32
  }
  func.func @transform_5(%arg0: i32) -> (i32, i32) {
    %c0_i32 = arith.constant 0 : i32
    %c0_i32_0 = arith.constant 0 : i32
    %c0_i32_1 = arith.constant 0 : i32
    return %c0_i32, %c0_i32_0 : i32, i32
  }
  func.func @transform_6(%arg0: i32) -> (i32, i32) {
    %c0_i32 = arith.constant 0 : i32
    %c0_i32_0 = arith.constant 0 : i32
    return %arg0, %c0_i32 : i32, i32
  }
}

</mosaic_0001>

<bundles_post_ra>
// kernel: forward.1
= control target key start
LH: loop header
LB: loop body
LE: loop exit
PB: predicated region body
PF: predicated region fallthrough
CT: control target
= control target key end

     0   :  { %s2505_s21 = smov 0   ;;  %s3537_s0 = inlined_call_operand.vmem [shape: s32[320,1], index: 0, kind: input, shape index: {}]   ;;  %s3538_s1 = inlined_call_operand.vmem [shape: bf16[56,32], index: 1, kind: input, shape index: {}]   ;;  %s3539_s2 = inlined_call_operand.vmem [shape: bf16[160,128], index: 2, kind: input, shape index: {}]   ;;  %s3540_s3 = inlined_call_operand.vmem [shape: f32[16,128], index: 3, kind: input, shape index: {}]   ;;  %s3541_s4 = inlined_call_operand.vmem [shape: f32[128,128], index: 4, kind: input, shape index: {}]   ;;  %s3542_s5 = inlined_call_operand.vmem [shape: f32[1,128], index: 5, kind: input, shape index: {}]   ;;  %s3543_s6 = inlined_call_operand.vmem [shape: f32[16,128], index: 6, kind: output, shape index: {}]  }
   0x1 LB: > { %s2511_s22 = sadd.s32 4294967295, %s2466_s21   ;;  %p2306_p0 = scmp.ge.s32.totalorder %s2466_s21, 1  ;;  %s2466_s21 = sphi %s2505_s21, %s16_s21  }
   0x2   : > { %p213_p1 = scmp.lt.s32.totalorder %s2466_s21, 3 }
   0x4   : > { %p214_p2 = pnand %p2306_p0, %p213_p1 }
   0x6   : > { %217 = sbr.rel (%p214_p2) target bundleno = 998 (0x3e6), region = 44 }
   0xb   : > { %s242_s23 = smul.u32 20, %s2511_s22  ;;  %v2468_v0 = vmov 0   ;;  %v391_v21 = vld [vmem:[%s3538_s1 + $0x18] sm:$0xf]  ;;  %vm444_vm0 = vcmask 1043456   ;;  %v2431_v25 = vld [vmem:[%s3538_s1 + $0x10] sm:$0xff]  ;;  %v273_v28 = vlaneseq }
   0xc   : > { %2457 = vset.pattern.permute.xlu1 %v2468_v0  ;;  %2456 = vset.pattern.permute.xlu0 %v2468_v0  ;;  %v405_v22 = vunpack.c.l.b16 %v391_v21  ;;  %v2430_v26 = vld [vmem:[%s3538_s1 + $0x8] sm:$0xff]  ;;  %v2429_v27 = vld [vmem:[%s3538_s1] sm:$0xff]  ;;  %v2469_v33 = vmov 0.0   ;;  %vm413_vm3 = vcmask 457728   ;;  %p248_p4 = scmp.lt.s32.totalorder %s2511_s22, 1 }
   0xd   : > { %p243_p3 = scmp.lt.s32.totalorder %s242_s23, 39  ;;  %2458 = vset.pattern.permute.xlu2 %v2468_v0  ;;  %v2553_v30 = vand.u32 127, %v273_v28 }
   0xe   : > { %v409_v23 = vpack.c.b16 %v405_v22, %v405_v22  ;;  %s3652_s22 = smov (!%p248_p4, %s2511_s22), 1 }
   0xf   : > { %s3650_s23 = smov (!%p243_p3, %s242_s23), 39  ;;  %s2308_s26 = sshll.u32 %s3652_s22, 3 }
  0x10   : > { %s2307_s24 = sshll.u32 %s3650_s23, 3  ;;  %v446_v24 = vsel %vm444_vm0, %v409_v23, 0  ;;  %s251_s7 = scalar_lea.vmem %s3543_s6, %s2308_s26 }
  0x11   : > { %s2519_s27 = scalar_lea.vmem %s3537_s0, %s2307_s24  ;;  %452 = vmatpush.bf16.msra.mxu0 %v446_v24 }
  0x12   : > { %v255_v1 = vld [vmem:[%s2519_s27 + $0x10] sm:$0xff]  ;;  %v253_v2 = vld [vmem:[%s2519_s27] sm:$0xff]  ;;  %v256_v4 = vld [vmem:[%s2519_s27 + $0x18] sm:$0xff] }
  0x13   : > { %282 = vperm.xlu1 %2457, %v255_v1   ;;  %276 = vperm.xlu0 %2456, %v253_v2   ;;  %v257_v3 = vld [vmem:[%s2519_s27 + $0x20] sm:$0xff]  ;;  %v254_v5 = vld [vmem:[%s2519_s27 + $0x8] sm:$0xff]  ;;  %v260_v7 = vld [vmem:[%s2519_s27 + $0x38] sm:$0xff] }
  0x14   : > { %288 = vperm.xlu2 %2458, %v257_v3   ;;  %v258_v6 = vld [vmem:[%s2519_s27 + $0x28] sm:$0xff]  ;;  %v259_v8 = vld [vmem:[%s2519_s27 + $0x30] sm:$0xff]  ;;  %v261_v9 = vld [vmem:[%s2519_s27 + $0x40] sm:$0xff] }
  0x15   : > { %v263_v10 = vld [vmem:[%s2519_s27 + $0x50] sm:$0xff]  ;;  %v262_v11 = vld [vmem:[%s2519_s27 + $0x48] sm:$0xff]  ;;  %v264_v12 = vld [vmem:[%s2519_s27 + $0x58] sm:$0xff]  ;;  %453 = vmatpush.bf16.msra.mxu0 %v2431_v25 }
  0x16   : > { %v266_v13 = vld [vmem:[%s2519_s27 + $0x68] sm:$0xff]  ;;  %v265_v14 = vld [vmem:[%s2519_s27 + $0x60] sm:$0xff]  ;;  %v267_v15 = vld [vmem:[%s2519_s27 + $0x70] sm:$0xff] }
  0x17   : > { %v269_v16 = vld [vmem:[%s2519_s27 + $0x80] sm:$0xff]  ;;  %v268_v17 = vld [vmem:[%s2519_s27 + $0x78] sm:$0xff]  ;;  %v270_v18 = vld [vmem:[%s2519_s27 + $0x88] sm:$0xff] }
  0x18   : > { %v272_v19 = vld [vmem:[%s2519_s27 + $0x98] sm:$0xff]  ;;  %v271_v20 = vld [vmem:[%s2519_s27 + $0x90] sm:$0xff] }
  0x19   : > { %454 = vmatpush.bf16.msra.mxu0 %v2430_v26 }
  0x1b   : > { %285 = vperm.xlu1 %2457, %v256_v4   ;;  %279 = vperm.xlu0 %2456, %v254_v5  }
  0x1c   : > { %291 = vperm.xlu2 %2458, %v258_v6  }
  0x1d   : > { %455 = vmatpush.bf16.msra.mxu0 %v2429_v27 }
  0x23   : > { %297 = vperm.xlu1 %2457, %v260_v7   ;;  %294 = vperm.xlu0 %2456, %v259_v8  }
  0x24   : > { %300 = vperm.xlu2 %2458, %v261_v9  }
  0x2b   : > { %306 = vperm.xlu1 %2457, %v263_v10   ;;  %303 = vperm.xlu0 %2456, %v262_v11   ;;  %v2435_v10 = vld [vmem:[%s3539_s2 + $0x18] sm:$0xff] }
  0x2c   : > { %309 = vperm.xlu2 %2458, %v264_v12   ;;  %1170 = vmatpush.bf16.msra.mxu1 %v2435_v10 }
  0x2d   : > { %2442 = vmatpush.bf16.msra.mxu3 %v2435_v10 }
  0x33   : > { %315 = vperm.xlu1 %2457, %v266_v13   ;;  %312 = vperm.xlu0 %2456, %v265_v14  }
  0x34   : > { %318 = vperm.xlu2 %2458, %v267_v15   ;;  %v2434_v15 = vld [vmem:[%s3539_s2 + $0x10] sm:$0xff] }
  0x35   : > { %1171 = vmatpush.bf16.msra.mxu1 %v2434_v15  ;;  %2443 = vmatpush.bf16.msra.mxu3 %v2434_v15 }
  0x3b   : > { %324 = vperm.xlu1 %2457, %v269_v16   ;;  %321 = vperm.xlu0 %2456, %v268_v17  }
  0x3c   : > { %327 = vperm.xlu2 %2458, %v270_v18  }
  0x43   : > { %333 = vperm.xlu1 %2457, %v272_v19   ;;  %330 = vperm.xlu0 %2456, %v271_v20  }
  0x6e   : > { %v289_v40 = vpop.permute.xlu2 %288 }
  0x6f   : > { %vm339_vm6 = vcmp.eq.s32.totalorder %v2553_v30, %v289_v40 }
  0x70   : > { %v359_v43 = vsel %vm339_vm6, 1.0, %v2469_v33  ;;  %vm713_vm6 = vsmask.f32 1280 }
  0x76   : > { %v292_v42 = vpop.permute.xlu2 %291 }
  0x77   : > { %vm340_vm7 = vcmp.eq.s32.totalorder %v2553_v30, %v292_v42 }
  0x78   : > { %v360_v44 = vsel %vm340_vm7, 1.0, %v2469_v33  ;;  %vm714_vm7 = vsmask.f32 3336 }
  0x79   : > { %v377_v45 = vpack.c.bf16 %v360_v44, %v359_v43 }
  0x7e   : > { %v301_v52 = vpop.permute.xlu2 %300 }
  0x7f   : > { %vm343_vm10 = vcmp.eq.s32.totalorder %v2553_v30, %v301_v52 }
  0x80   : > { %v363_v53 = vsel %vm343_vm10, 1.0, %v2469_v33  ;;  %vm1625_vm10 = vsmask.f32 2312 }
  0x85   : > { %v277_v29 = vpop.permute.xlu0 %276  ;;  %v283_v32 = vpop.permute.xlu1 %282 }
  0x86   : > { %vm335_vm1 = vcmp.eq.s32.totalorder %v2553_v30, %v277_v29  ;;  %vm337_vm4 = vcmp.eq.s32.totalorder %v2553_v30, %v283_v32  ;;  %v310_v57 = vpop.permute.xlu2 %309 }
  0x87   : > { %v355_v34 = vsel %vm335_vm1, 1.0, %v2469_v33  ;;  %v357_v38 = vsel %vm337_vm4, 1.0, %v2469_v33  ;;  %vm346_vm12 = vcmp.eq.s32.totalorder %v2553_v30, %v310_v57 }
  0x88   : > { %v366_v58 = vsel %vm346_vm12, 1.0, %v2469_v33  ;;  %vm716_vm12 = vsmask.f32 5392 }
  0x8d   : > { %v280_v31 = vpop.permute.xlu0 %279  ;;  %v286_v37 = vpop.permute.xlu1 %285 }
  0x8e   : > { %vm336_vm2 = vcmp.eq.s32.totalorder %v2553_v30, %v280_v31  ;;  %vm338_vm5 = vcmp.eq.s32.totalorder %v2553_v30, %v286_v37  ;;  %v319_v3 = vpop.permute.xlu2 %318 }
  0x8f   : > { %v356_v35 = vsel %vm336_vm2, 1.0, %v2469_v33  ;;  %v358_v39 = vsel %vm338_vm5, 1.0, %v2469_v33  ;;  %vm349_vm1 = vcmp.eq.s32.totalorder %v2553_v30, %v319_v3  ;;  %vm567_vm5 = vcmask 1041408  }
  0x90   : > { %v375_v36 = vpack.c.bf16 %v356_v35, %v355_v34  ;;  %v376_v41 = vpack.c.bf16 %v358_v39, %v357_v38  ;;  %v369_v5 = vsel %vm349_vm1, 1.0, %v2469_v33  ;;  %vm1629_vm1 = vsmask.f32 6424 }
  0x92   : > { %2321 = vmatmul.msk.bf16.vlgmr.msra.gmra.mxu0 %vm413_vm3, %v375_v36 }
  0x95   : > { %v298_v46 = vpop.permute.xlu1 %297  ;;  %v295_v47 = vpop.permute.xlu0 %294 }
  0x96   : > { %vm342_vm8 = vcmp.eq.s32.totalorder %v2553_v30, %v298_v46  ;;  %vm341_vm9 = vcmp.eq.s32.totalorder %v2553_v30, %v295_v47  ;;  %v328_v8 = vpop.permute.xlu2 %327 }
  0x97   : > { %v362_v48 = vsel %vm342_vm8, 1.0, %v2469_v33  ;;  %v361_v49 = vsel %vm341_vm9, 1.0, %v2469_v33  ;;  %vm352_vm4 = vcmp.eq.s32.totalorder %v2553_v30, %v328_v8  ;;  %vm572_vm8 = vcmask 1043458  }
  0x98   : > { %v378_v50 = vpack.c.bf16 %v362_v48, %v361_v49  ;;  %v372_v11 = vsel %vm352_vm4, 1.0, %v2469_v33  ;;  %vm1624_vm9 = vsmask.f32 256 }
  0x9d   : > { %v304_v51 = vpop.permute.xlu0 %303  ;;  %v307_v56 = vpop.permute.xlu1 %306 }
  0x9e   : > { %vm344_vm11 = vcmp.eq.s32.totalorder %v2553_v30, %v304_v51  ;;  %vm345_vm13 = vcmp.eq.s32.totalorder %v2553_v30, %v307_v56 }
  0x9f   : > { %v364_v54 = vsel %vm344_vm11, 1.0, %v2469_v33  ;;  %v365_v59 = vsel %vm345_vm13, 1.0, %v2469_v33  ;;  %vm715_vm11 = vmor %vm713_vm6, %vm714_vm7 }
  0xa0   : > { %v379_v55 = vpack.c.bf16 %v364_v54, %v363_v53  ;;  %v380_v60 = vpack.c.bf16 %v366_v58, %v365_v59  ;;  %vm1626_vm13 = vmor %vm1624_vm9, %vm1625_vm10 }
  0xa2   : > { %2322 = vmatmul.msk.bf16.gmra.mxu0 %vm413_vm3, %v376_v41 }
  0xa5   : > { %v316_v61 = vpop.permute.xlu1 %315  ;;  %v313_v62 = vpop.permute.xlu0 %312 }
  0xa6   : > { %vm348_vm14 = vcmp.eq.s32.totalorder %v2553_v30, %v316_v61  ;;  %vm347_vm15 = vcmp.eq.s32.totalorder %v2553_v30, %v313_v62 }
  0xa7   : > { %v368_v63 = vsel %vm348_vm14, 1.0, %v2469_v33  ;;  %v367_v0 = vsel %vm347_vm15, 1.0, %v2469_v33  ;;  %vm1627_vm14 = vsmask.f32 4368  ;;  %vm717_vm15 = vmor %vm715_vm11, %vm716_vm12  ;;  %vm1340_vm11 = vcmask 1044484  }
  0xa8   : > { %v381_v1 = vpack.c.bf16 %v368_v63, %v367_v0 }
  0xad   : > { %v322_v2 = vpop.permute.xlu0 %321  ;;  %v325_v7 = vpop.permute.xlu1 %324 }
  0xae   : > { %vm350_vm0 = vcmp.eq.s32.totalorder %v2553_v30, %v322_v2  ;;  %vm351_vm2 = vcmp.eq.s32.totalorder %v2553_v30, %v325_v7 }
  0xaf   : > { %v370_v4 = vsel %vm350_vm0, 1.0, %v2469_v33  ;;  %v371_v9 = vsel %vm351_vm2, 1.0, %v2469_v33  ;;  %vm718_vm0 = vsmask.f32 7448  ;;  %vm1628_vm2 = vmor %vm1626_vm13, %vm1627_vm14  ;;  %vm1342_vm13 = vcmask 1046534  }
  0xb0   : > { %v382_v6 = vpack.c.bf16 %v370_v4, %v369_v5  ;;  %v383_v12 = vpack.c.bf16 %v372_v11, %v371_v9  ;;  %vm2617_vm6 = vmor %vm717_vm15, %vm718_vm0  ;;  %vm2213_vm15 = vcmask 1041409   ;;  %vm2217_vm0 = vcmask 1043459  }
  0xb1   : > { %vm2623_vm9 = vmor %vm1628_vm2, %vm1629_vm1  ;;  %vm2221_vm1 = vcmask 1045509   ;;  %vm2225_vm2 = vcmask 1047559  }
  0xb2   : > { %2323 = vmatmul.msk.bf16.gmra.mxu0 %vm413_vm3, %v377_v45 }
  0xb5   : > { %v334_v19 = vpop.permute.xlu1 %333  ;;  %v331_v23 = vpop.permute.xlu0 %330 }
  0xb6   : > { %vm354_vm4 = vcmp.eq.s32.totalorder %v2553_v30, %v334_v19  ;;  %vm353_vm7 = vcmp.eq.s32.totalorder %v2553_v30, %v331_v23 }
  0xb7   : > { %v374_v42 = vsel %vm354_vm4, 1.0, %v2469_v33  ;;  %v373_v30 = vsel %vm353_vm7, 1.0, %v2469_v33 }
  0xb8   : > { %v384_v53 = vpack.c.bf16 %v374_v42, %v373_v30 }
  0xc2   : > { %2324 = vmatmul.msk.bf16.gmra.mxu0 %vm413_vm3, %v378_v50 }
  0xd2   : > { %2325 = vmatmul.msk.bf16.gmra.mxu0 %vm413_vm3, %v379_v55 }
  0xe2   : > { %2326 = vmatmul.msk.bf16.gmra.mxu0 %vm413_vm3, %v380_v60 }
  0xf2   : > { %2327 = vmatmul.msk.bf16.gmra.mxu0 %vm413_vm3, %v381_v1 }
 0x102   : > { %2328 = vmatmul.msk.bf16.gmra.mxu0 %vm413_vm3, %v382_v6 }
 0x10f   : > { %v457_v13 = vpop.f32.mrf.mxu0 }
 0x110   : > { %v507_v14 = vpack.c.bf16 %v457_v13, %v457_v13 }
 0x112   : > { %v547_v16 = vrot.slane %v507_v14, 2  ;;  %2329 = vmatmul.msk.bf16.gmra.mxu0 %vm413_vm3, %v383_v12 }
 0x114   : > { %v2607_v17 = vsel %vm567_vm5, %v507_v14, %v547_v16  ;;  %v573_v18 = vsel %vm572_vm8, %v507_v14, %v547_v16 }
 0x115   : > { %v2610_v20 = vrot.slane %v573_v18, 2  ;;  %v720_v21 = vshrl.u32 %v2607_v17, 16  ;;  %v723_v22 = vshll.u32 %v2607_v17, 16 }
 0x117   : > { %v722_v24 = vrot.slane %v720_v21, 6  ;;  %v725_v25 = vrot.slane %v723_v22, 7  ;;  %v729_v26 = vshll.u32 %v2610_v20, 16  ;;  %v733_v27 = vshrl.u32 %v2610_v20, 16  ;;  %v459_v28 = vpop.f32.mrf.mxu0 }
 0x118   : > { %v508_v29 = vpack.c.bf16 %v459_v28, %v459_v28  ;;  %v2627_v40 = vrot.slane %v720_v21, 9 }
 0x119   : > { %v726_v32 = vor.u32 %v725_v25, %v722_v24  ;;  %v731_v34 = vrot.slane %v729_v26, 7  ;;  %v735_v35 = vrot.slane %v733_v27, 6  ;;  %v1633_v36 = vrot.slane %v733_v27, 7 }
 0x11a   : > { %v548_v38 = vrot.slane %v508_v29, 2 }
 0x11b   : > { %v727_v39 = vrot.slane %v726_v32, 2  ;;  %v2629_v41 = vor.u32 %v1633_v36, %v729_v26  ;;  %v736_v43 = vor.u32 %v735_v35, %v731_v34  ;;  %v1636_v0 = vrot.slane %v1633_v36, 2 }
 0x11c   : > { %v2633_v44 = vsel %vm567_vm5, %v508_v29, %v548_v38  ;;  %v580_v45 = vsel %vm572_vm8, %v508_v29, %v548_v38 }
 0x11d   : > { %v732_v46 = vsel %vm2617_vm6, %v727_v39, %v731_v34  ;;  %v2643_v48 = vrot.slane %v580_v45, 2  ;;  %v738_v49 = vshll.u32 %v2633_v44, 16  ;;  %v742_v50 = vshrl.u32 %v2633_v44, 16 }
 0x11e   : > { %1057 = vst [vmem:[#allocation1] ss:$4 sm:$0xff] %v732_v46  ;;  %v737_v54 = vrot.slane %v736_v43, 2 }
 0x11f   : > { %v748_v51 = vshll.u32 %v2643_v48, 16  ;;  %v752_v52 = vshrl.u32 %v2643_v48, 16  ;;  %v462_v33 = vpop.f32.mrf.mxu0  ;;  %v740_v55 = vrot.slane %v738_v49, 7  ;;  %v744_v56 = vrot.slane %v742_v50, 6 }
 0x120   : > { %v1637_v59 = vrot.slane %v742_v50, 7  ;;  %v509_v63 = vpack.c.bf16 %v462_v33, %v462_v33 }
 0x121   : > { %v750_v57 = vrot.slane %v748_v51, 7  ;;  %v754_v58 = vrot.slane %v752_v52, 6  ;;  %v1641_v60 = vrot.slane %v752_v52, 7  ;;  %v741_v61 = vsel %vm2617_vm6, %v737_v54, %v740_v55 }
 0x122   : > { %v745_v62 = vor.u32 %v744_v56, %v740_v55  ;;  %2330 = vmatmul.msk.bf16.gmra.mxu0 %vm413_vm3, %v384_v53  ;;  %1060 = vst [vmem:[#allocation1 + $0x1] ss:$4 sm:$0xff] %v741_v61  ;;  %v1638_v1 = vor.u32 %v1637_v59, %v738_v49  ;;  %v1640_v2 = vrot.slane %v1637_v59, 2  ;;  %v549_v5 = vrot.slane %v509_v63, 2 }
 0x123   : > { %v1642_v3 = vor.u32 %v1641_v60, %v748_v51  ;;  %v755_v8 = vor.u32 %v754_v58, %v750_v57  ;;  %v1644_v28 = vrot.slane %v1641_v60, 2  ;;  %vm1147_vm3 = vcmask 261120  }
 0x124   : > { %v746_v4 = vrot.slane %v745_v62, 2  ;;  %v2654_v6 = vsel %vm2623_vm9, %v1636_v0, %v1638_v1  ;;  %v2663_v10 = vsel %vm567_vm5, %v509_v63, %v549_v5  ;;  %v587_v11 = vsel %vm572_vm8, %v509_v63, %v549_v5 }
 0x125   : > { %v2658_v7 = vsel %vm2623_vm9, %v1640_v2, %v1642_v3  ;;  %v2666_v12 = vrot.slane %v587_v11, 2  ;;  %v757_v13 = vshll.u32 %v2663_v10, 16  ;;  %v1645_v14 = vshrl.u32 %v2663_v10, 16 }
 0x126   : > { %3565 = vst [vmem:[#allocation2_spill] sm:$0xff] %v2658_v7  ;;  %v751_v9 = vsel %vm2617_vm6, %v746_v4, %v750_v57  ;;  %v756_v18 = vrot.slane %v755_v8, 2 }
 0x127   : > { %1063 = vst [vmem:[#allocation1 + $0x2] ss:$4 sm:$0xff] %v751_v9  ;;  %v464_v15 = vpop.f32.mrf.mxu0  ;;  %v759_v19 = vrot.slane %v757_v13, 7  ;;  %v762_v21 = vshrl.u32 %v2666_v12, 16  ;;  %v765_v22 = vshll.u32 %v2666_v12, 16  ;;  %v1647_v23 = vrot.slane %v1645_v14, 7 }
 0x128   : > { %v510_v16 = vpack.c.bf16 %v464_v15, %v464_v15 }
 0x129   : > { %v760_v25 = vsel %vm2617_vm6, %v756_v18, %v759_v19  ;;  %v764_v26 = vrot.slane %v762_v21, 6  ;;  %v767_v27 = vrot.slane %v765_v22, 7  ;;  %v1648_v29 = vor.u32 %v1647_v23, %v757_v13 }
 0x12a   : > { %v550_v24 = vrot.slane %v510_v16, 2  ;;  %1066 = vst [vmem:[#allocation1 + $0x3] ss:$4 sm:$0xff] %v760_v25  ;;  %v2690_v57 = vrot.slane %v762_v21, 9 }
 0x12b   : > { %v768_v35 = vor.u32 %v767_v27, %v764_v26  ;;  %v2684_v42 = vsel %vm2623_vm9, %v1644_v28, %v1648_v29 }
 0x12c   : > { %v2675_v32 = vsel %vm567_vm5, %v510_v16, %v550_v24  ;;  %v594_v34 = vsel %vm572_vm8, %v510_v16, %v550_v24  ;;  %3566 = vst [vmem:[#allocation3_spill] sm:$0xff] %v2684_v42 }
 0x12d   : > { %v2678_v36 = vrot.slane %v594_v34, 2  ;;  %v770_v38 = vshll.u32 %v2675_v32, 16  ;;  %v774_v39 = vshrl.u32 %v2675_v32, 16  ;;  %v769_v43 = vrot.slane %v768_v35, 2  ;;  %3567 = vst [vmem:[#allocation4_spill] sm:$0xff] %v2690_v57 }
 0x12f   : > { %v772_v45 = vrot.slane %v770_v38, 7  ;;  %v776_v30 = vrot.slane %v774_v39, 6  ;;  %v780_v46 = vshll.u32 %v2678_v36, 16  ;;  %v467_v49 = vpop.f32.mrf.mxu0  ;;  %v784_v50 = vshrl.u32 %v2678_v36, 16 }
 0x130   : > { %v1652_v33 = vrot.slane %v774_v39, 7  ;;  %v511_v60 = vpack.c.bf16 %v467_v49, %v467_v49 }
 0x131   : > { %v773_v51 = vsel %vm2617_vm6, %v769_v43, %v772_v45  ;;  %v777_v52 = vor.u32 %v776_v30, %v772_v45  ;;  %v782_v53 = vrot.slane %v780_v46, 7  ;;  %v786_v54 = vrot.slane %v784_v50, 6  ;;  %v1079_v56 = vld.sshfl [vmem:[#allocation1] sm:$0xff pattern:$0x73625140] }
 0x132   : > { %1069 = vst [vmem:[#allocation1 + $0x20] ss:$4 sm:$0xff] %v773_v51  ;;  %v1656_v55 = vrot.slane %v784_v50, 7  ;;  %v2692_v59 = vor.u32 %v1652_v33, %v770_v38  ;;  %v1655_v61 = vrot.slane %v1652_v33, 2  ;;  %2339 = vmatmul.msk.bf16.vlgmr.msra.gmra.mxu1 %vm1147_vm3, %v1079_v56  ;;  %v551_v1 = vrot.slane %v511_v60, 2 }
 0x133   : > { %v778_v58 = vrot.slane %v777_v52, 2  ;;  %v787_v2 = vor.u32 %v786_v54, %v782_v53 }
 0x134   : > { %3568 = vst [vmem:[#allocation5_spill] sm:$0xff] %v2692_v59  ;;  %v1657_v62 = vor.u32 %v1656_v55, %v780_v46  ;;  %v2706_v4 = vsel %vm567_vm5, %v511_v60, %v551_v1  ;;  %v601_v5 = vsel %vm572_vm8, %v511_v60, %v551_v1  ;;  %v1659_v26 = vrot.slane %v1656_v55, 2 }
 0x135   : > { %v783_v63 = vsel %vm2617_vm6, %v778_v58, %v782_v53  ;;  %3570 = vst [vmem:[#allocation7_spill] sm:$0xff] %v2706_v4  ;;  %v2709_v9 = vrot.slane %v601_v5, 2  ;;  %v789_v11 = vshll.u32 %v2706_v4, 16  ;;  %v793_v13 = vshrl.u32 %v2706_v4, 16 }
 0x136   : > { %1072 = vst [vmem:[#allocation1 + $0x21] ss:$4 sm:$0xff] %v783_v63  ;;  %v2703_v3 = vsel %vm2623_vm9, %v1655_v61, %v1657_v62  ;;  %v788_v15 = vrot.slane %v787_v2, 2 }
 0x137   : > { %3569 = vst [vmem:[#allocation6_spill] sm:$0xff] %v2703_v3  ;;  %v469_v8 = vpop.f32.mrf.mxu0  ;;  %v791_v16 = vrot.slane %v789_v11, 7  ;;  %v795_v18 = vrot.slane %v793_v13, 6  ;;  %v799_v19 = vshll.u32 %v2709_v9, 16  ;;  %v1660_v21 = vrot.slane %v793_v13, 7 }
 0x138   : > { %v512_v14 = vpack.c.bf16 %v469_v8, %v469_v8  ;;  %v1664_v22 = vshrl.u32 %v2709_v9, 16 }
 0x139   : > { %v792_v23 = vsel %vm2617_vm6, %v788_v15, %v791_v16  ;;  %v796_v24 = vor.u32 %v795_v18, %v791_v16  ;;  %v801_v27 = vrot.slane %v799_v19, 7  ;;  %v1661_v28 = vor.u32 %v1660_v21, %v789_v11 }
 0x13a   : > { %v552_v25 = vrot.slane %v512_v14, 2  ;;  %1075 = vst [vmem:[#allocation1 + $0x22] ss:$4 sm:$0xff] %v792_v23  ;;  %v1666_v29 = vrot.slane %v1664_v22, 7  ;;  %v1663_v35 = vrot.slane %v1660_v21, 2 }
 0x13b   : > { %v797_v34 = vrot.slane %v796_v24, 2  ;;  %v2723_v43 = vsel %vm2623_vm9, %v1659_v26, %v1661_v28 }
 0x13c   : > { %v2718_v38 = vsel %vm567_vm5, %v512_v14, %v552_v25  ;;  %v608_v39 = vsel %vm572_vm8, %v512_v14, %v552_v25  ;;  %3571 = vst [vmem:[#allocation8_spill] sm:$0xff] %v2723_v43  ;;  %v1667_v45 = vor.u32 %v1666_v29, %v799_v19 }
 0x13d   : > { %v2725_v30 = vrot.slane %v608_v39, 2  ;;  %v803_v46 = vshrl.u32 %v2718_v38, 16  ;;  %v802_v50 = vsel %vm2617_vm6, %v797_v34, %v801_v27  ;;  %v806_v51 = vshll.u32 %v2718_v38, 16 }
 0x13e   : > { %1078 = vst [vmem:[#allocation1 + $0x23] ss:$4 sm:$0xff] %v802_v50  ;;  %v2733_v33 = vsel %vm2623_vm9, %v1663_v35, %v1667_v45 }
 0x13f   : > { %v472_v49 = vpop.f32.mrf.mxu0  ;;  %3572 = vst [vmem:[#allocation9_spill] sm:$0xff] %v2733_v33  ;;  %v805_v53 = vrot.slane %v803_v46, 6  ;;  %v812_v54 = vshll.u32 %v2725_v30, 16  ;;  %v816_v55 = vshrl.u32 %v2725_v30, 16  ;;  %v808_v56 = vrot.slane %v806_v51, 7 }
 0x140   : > { %v513_v52 = vpack.c.bf16 %v472_v49, %v472_v49  ;;  %v2740_v5 = vrot.slane %v803_v46, 9 }
 0x141   : > { %v814_v60 = vrot.slane %v812_v54, 7  ;;  %v818_v61 = vrot.slane %v816_v55, 6  ;;  %v1671_v62 = vrot.slane %v816_v55, 7  ;;  %v809_v63 = vor.u32 %v808_v56, %v805_v53 }
 0x142   : > { %v553_v58 = vrot.slane %v513_v52, 2  ;;  %3573 = vst [vmem:[#allocation10_spill] sm:$0xff] %v2740_v5 }
 0x143   : > { %v819_v2 = vor.u32 %v818_v61, %v814_v60  ;;  %v2742_v8 = vor.u32 %v1671_v62, %v812_v54  ;;  %v810_v13 = vrot.slane %v809_v63, 2  ;;  %v1674_v49 = vrot.slane %v1671_v62, 2 }
 0x144   : > { %v2738_v1 = vsel %vm567_vm5, %v513_v52, %v553_v58  ;;  %v615_v11 = vsel %vm572_vm8, %v513_v52, %v553_v58 }
 0x145   : > { %3574 = vst [vmem:[#allocation11_spill] sm:$0xff] %v2742_v8  ;;  %v2745_v14 = vrot.slane %v615_v11, 2  ;;  %v821_v15 = vshll.u32 %v2738_v1, 16  ;;  %v825_v16 = vshrl.u32 %v2738_v1, 16  ;;  %v820_v19 = vrot.slane %v819_v2, 2 }
 0x146   : > { %v1080_v22 = vld.sshfl [vmem:[#allocation1 + $0x20] sm:$0xff pattern:$0x73625140]  ;;  %v815_v23 = vsel %vm2617_vm6, %v810_v13, %v814_v60 }
 0x147   : > { %v474_v21 = vpop.f32.mrf.mxu0  ;;  %v823_v24 = vrot.slane %v821_v15, 7  ;;  %v827_v25 = vrot.slane %v825_v16, 6  ;;  %v831_v26 = vshll.u32 %v2745_v14, 16  ;;  %1082 = vst [vmem:[#allocation1] ss:$4 sm:$0xff] %v815_v23  ;;  %v835_v27 = vshrl.u32 %v2745_v14, 16  ;;  %2340 = vmatmul.msk.bf16.gmra.mxu1 %vm1147_vm3, %v1080_v22 }
 0x148   : > { %v1675_v35 = vrot.slane %v825_v16, 7  ;;  %v514_v46 = vpack.c.bf16 %v474_v21, %v474_v21 }
 0x149   : > { %v824_v28 = vsel %vm2617_vm6, %v820_v19, %v823_v24  ;;  %v828_v29 = vor.u32 %v827_v25, %v823_v24  ;;  %v833_v34 = vrot.slane %v831_v26, 7  ;;  %v837_v39 = vrot.slane %v835_v27, 6 }
 0x14a   : > { %1084 = vst [vmem:[#allocation1 + $0x1] ss:$4 sm:$0xff] %v824_v28  ;;  %v1679_v45 = vrot.slane %v835_v27, 7  ;;  %v1676_v51 = vor.u32 %v1675_v35, %v821_v15  ;;  %v1678_v52 = vrot.slane %v1675_v35, 2  ;;  %v554_v54 = vrot.slane %v514_v46, 2 }
 0x14b   : > { %v829_v50 = vrot.slane %v828_v29, 2  ;;  %v838_v58 = vor.u32 %v837_v39, %v833_v34 }
 0x14c   : > { %v1680_v53 = vor.u32 %v1679_v45, %v831_v26  ;;  %v2764_v56 = vsel %vm2623_vm9, %v1674_v49, %v1676_v51  ;;  %v2771_v61 = vsel %vm567_vm5, %v514_v46, %v554_v54  ;;  %v622_v62 = vsel %vm572_vm8, %v514_v46, %v554_v54 }
 0x14d   : > { %v834_v55 = vsel %vm2617_vm6, %v829_v50, %v833_v34  ;;  %3575 = vst [vmem:[#allocation12_spill] sm:$0xff] %v2764_v56  ;;  %v2774_v2 = vrot.slane %v622_v62, 2  ;;  %v840_v11 = vshll.u32 %v2771_v61, 16  ;;  %v1683_v13 = vshrl.u32 %v2771_v61, 16 }
 0x14e   : > { %1086 = vst [vmem:[#allocation1 + $0x2] ss:$4 sm:$0xff] %v834_v55  ;;  %v2768_v60 = vsel %vm2623_vm9, %v1678_v52, %v1680_v53  ;;  %v839_v16 = vrot.slane %v838_v58, 2  ;;  %v1682_v28 = vrot.slane %v1679_v45, 2 }
 0x14f   : > { %3576 = vst [vmem:[#allocation13_spill] sm:$0xff] %v2768_v60  ;;  %v477_v63 = vpop.f32.mrf.mxu0  ;;  %v842_v19 = vrot.slane %v840_v11, 7  ;;  %v845_v21 = vshrl.u32 %v2774_v2, 16  ;;  %v848_v22 = vshll.u32 %v2774_v2, 16  ;;  %v1685_v23 = vrot.slane %v1683_v13, 7 }
 0x150   : > { %v515_v15 = vpack.c.bf16 %v477_v63, %v477_v63 }
 0x151   : > { %v843_v25 = vsel %vm2617_vm6, %v839_v16, %v842_v19  ;;  %v847_v26 = vrot.slane %v845_v21, 6  ;;  %v850_v27 = vrot.slane %v848_v22, 7  ;;  %v1686_v29 = vor.u32 %v1685_v23, %v840_v11 }
 0x152   : > { %v555_v24 = vrot.slane %v515_v15, 2  ;;  %1088 = vst [vmem:[#allocation1 + $0x3] ss:$4 sm:$0xff] %v843_v25  ;;  %v2798_v22 = vrot.slane %v845_v21, 9 }
 0x153   : > { %v851_v39 = vor.u32 %v850_v27, %v847_v26  ;;  %v2792_v51 = vsel %vm2623_vm9, %v1682_v28, %v1686_v29 }
 0x154   : > { %v2783_v34 = vsel %vm567_vm5, %v515_v15, %v555_v24  ;;  %v629_v35 = vsel %vm572_vm8, %v515_v15, %v555_v24  ;;  %3577 = vst [vmem:[#allocation14_spill] sm:$0xff] %v2792_v51 }
 0x155   : > { %v2786_v46 = vrot.slane %v629_v35, 2  ;;  %v853_v49 = vshll.u32 %v2783_v34, 16  ;;  %v857_v50 = vshrl.u32 %v2783_v34, 16  ;;  %v852_v53 = vrot.slane %v851_v39, 2  ;;  %3578 = vst [vmem:[#allocation15_spill] sm:$0xff] %v2798_v22 }
 0x157   : > { %v479_v52 = vpop.f32.mrf.mxu0  ;;  %v855_v45 = vrot.slane %v853_v49, 7  ;;  %v859_v54 = vrot.slane %v857_v50, 6  ;;  %v863_v55 = vshll.u32 %v2786_v46, 16  ;;  %v867_v58 = vshrl.u32 %v2786_v46, 16 }
 0x158   : > { %v1690_v11 = vrot.slane %v857_v50, 7  ;;  %v516_v25 = vpack.c.bf16 %v479_v52, %v479_v52 }
 0x159   : > { %v856_v62 = vsel %vm2617_vm6, %v852_v53, %v855_v45  ;;  %v860_v63 = vor.u32 %v859_v54, %v855_v45  ;;  %v865_v13 = vrot.slane %v863_v55, 7  ;;  %v869_v15 = vrot.slane %v867_v58, 6  ;;  %v1097_v19 = vld.sshfl [vmem:[#allocation1] sm:$0xff pattern:$0x73625140] }
 0x15a   : > { %1090 = vst [vmem:[#allocation1 + $0x20] ss:$4 sm:$0xff] %v856_v62  ;;  %v1694_v16 = vrot.slane %v867_v58, 7  ;;  %v2800_v24 = vor.u32 %v1690_v11, %v853_v49  ;;  %v1693_v26 = vrot.slane %v1690_v11, 2  ;;  %2341 = vmatmul.msk.bf16.gmra.mxu1 %vm1147_vm3, %v1097_v19  ;;  %v556_v35 = vrot.slane %v516_v25, 2 }
 0x15b   : > { %v861_v23 = vrot.slane %v860_v63, 2  ;;  %v870_v39 = vor.u32 %v869_v15, %v865_v13 }
 0x15c   : > { %3579 = vst [vmem:[#allocation16_spill] sm:$0xff] %v2800_v24  ;;  %v1695_v27 = vor.u32 %v1694_v16, %v863_v55  ;;  %v2814_v50 = vsel %vm567_vm5, %v516_v25, %v556_v35  ;;  %v636_v52 = vsel %vm572_vm8, %v516_v25, %v556_v35 }
 0x15d   : > { %v866_v28 = vsel %vm2617_vm6, %v861_v23, %v865_v13  ;;  %v2817_v45 = vrot.slane %v636_v52, 2  ;;  %v872_v54 = vshll.u32 %v2814_v50, 16  ;;  %v876_v55 = vshrl.u32 %v2814_v50, 16 }
 0x15e   : > { %1092 = vst [vmem:[#allocation1 + $0x21] ss:$4 sm:$0xff] %v866_v28  ;;  %v2811_v21 = vsel %vm2623_vm9, %v1693_v26, %v1695_v27  ;;  %v871_v62 = vrot.slane %v870_v39, 2  ;;  %v1697_v27 = vrot.slane %v1694_v16, 2 }
 0x15f   : > { %3580 = vst [vmem:[#allocation17_spill] sm:$0xff] %v2811_v21  ;;  %v482_v49 = vpop.f32.mrf.mxu0  ;;  %v874_v63 = vrot.slane %v872_v54, 7  ;;  %v878_v11 = vrot.slane %v876_v55, 6  ;;  %v882_v13 = vshll.u32 %v2817_v45, 16  ;;  %v1698_v15 = vrot.slane %v876_v55, 7 }
 0x160   : > { %v517_v53 = vpack.c.bf16 %v482_v49, %v482_v49  ;;  %v1702_v19 = vshrl.u32 %v2817_v45, 16 }
 0x161   : > { %v875_v23 = vsel %vm2617_vm6, %v871_v62, %v874_v63  ;;  %v879_v25 = vor.u32 %v878_v11, %v874_v63  ;;  %v884_v28 = vrot.slane %v882_v13, 7  ;;  %v1699_v35 = vor.u32 %v1698_v15, %v872_v54 }
 0x162   : > { %v557_v58 = vrot.slane %v517_v53, 2  ;;  %1094 = vst [vmem:[#allocation1 + $0x22] ss:$4 sm:$0xff] %v875_v23  ;;  %v1704_v49 = vrot.slane %v1702_v19, 7  ;;  %v1701_v63 = vrot.slane %v1698_v15, 2 }
 0x163   : > { %v880_v39 = vrot.slane %v879_v25, 2  ;;  %v2833_v62 = vsel %vm2623_vm9, %v1697_v27, %v1699_v35 }
 0x164   : > { %v2826_v26 = vsel %vm567_vm5, %v517_v53, %v557_v58  ;;  %v643_v52 = vsel %vm572_vm8, %v517_v53, %v557_v58  ;;  %3581 = vst [vmem:[#allocation18_spill] sm:$0xff] %v2833_v62  ;;  %v1705_v11 = vor.u32 %v1704_v49, %v882_v13 }
 0x165   : > { %v886_v29 = vshrl.u32 %v2826_v26, 16  ;;  %v889_v55 = vshll.u32 %v2826_v26, 16  ;;  %v2835_v18 = vrot.slane %v643_v52, 2  ;;  %v885_v16 = vsel %vm2617_vm6, %v880_v39, %v884_v28 }
 0x166   : > { %1096 = vst [vmem:[#allocation1 + $0x23] ss:$4 sm:$0xff] %v885_v16  ;;  %v2841_v53 = vsel %vm2623_vm9, %v1701_v63, %v1705_v11 }
 0x167   : > { %v484_v0 = vpop.f32.mrf.mxu0  ;;  %v888_v54 = vrot.slane %v886_v29, 6  ;;  %v891_v19 = vrot.slane %v889_v55, 7  ;;  %3582 = vst [vmem:[#allocation19_spill] sm:$0xff] %v2841_v53  ;;  %v895_v58 = vshll.u32 %v2835_v18, 16  ;;  %v899_v23 = vshrl.u32 %v2835_v18, 16 }
 0x168   : > { %v518_v27 = vpack.c.bf16 %v484_v0, %v484_v0  ;;  %v2847_v39 = vrot.slane %v886_v29, 9 }
 0x169   : > { %v892_v25 = vor.u32 %v891_v19, %v888_v54  ;;  %v897_v15 = vrot.slane %v895_v58, 7  ;;  %v901_v13 = vrot.slane %v899_v23, 6  ;;  %v1709_v49 = vrot.slane %v899_v23, 7 }
 0x16a   : > { %v558_v52 = vrot.slane %v518_v27, 2  ;;  %3583 = vst [vmem:[#allocation20_spill] sm:$0xff] %v2847_v39 }
 0x16b   : > { %v893_v35 = vrot.slane %v892_v25, 2  ;;  %v902_v47 = vor.u32 %v901_v13, %v897_v15  ;;  %v2849_v55 = vor.u32 %v1709_v49, %v895_v58 }
 0x16c   : > { %v2852_v63 = vsel %vm567_vm5, %v518_v27, %v558_v52  ;;  %v650_v0 = vsel %vm572_vm8, %v518_v27, %v558_v52 }
 0x16d   : > { %v898_v28 = vsel %vm2617_vm6, %v893_v35, %v897_v15  ;;  %3584 = vst [vmem:[#allocation21_spill] sm:$0xff] %v2849_v55  ;;  %v904_v16 = vshll.u32 %v2852_v63, 16  ;;  %v908_v54 = vshrl.u32 %v2852_v63, 16  ;;  %v1098_v19 = vld.sshfl [vmem:[#allocation1 + $0x20] sm:$0xff pattern:$0x73625140] }
 0x16e   : > { %1100 = vst [vmem:[#allocation1] ss:$4 sm:$0xff] %v898_v28  ;;  %v2861_v23 = vrot.slane %v650_v0, 2  ;;  %v903_v58 = vrot.slane %v902_v47, 2  ;;  %2342 = vmatmul.msk.bf16.gmra.mxu1 %vm1147_vm3, %v1098_v19  ;;  %v1712_v28 = vrot.slane %v1709_v49, 2 }
 0x16f   : > { %v487_v11 = vpop.f32.mrf.mxu0  ;;  %v906_v25 = vrot.slane %v904_v16, 7  ;;  %v910_v15 = vrot.slane %v908_v54, 6  ;;  %v1713_v13 = vrot.slane %v908_v54, 7 }
 0x170   : > { %v519_v35 = vpack.c.bf16 %v487_v11, %v487_v11  ;;  %v914_v27 = vshll.u32 %v2861_v23, 16  ;;  %v918_v52 = vshrl.u32 %v2861_v23, 16 }
 0x171   : > { %v907_v53 = vsel %vm2617_vm6, %v903_v58, %v906_v25  ;;  %v911_v62 = vor.u32 %v910_v15, %v906_v25  ;;  %v1714_v21 = vor.u32 %v1713_v13, %v904_v16  ;;  %v1716_v19 = vrot.slane %v1713_v13, 2 }
 0x172   : > { %v916_v29 = vrot.slane %v914_v27, 7  ;;  %v920_v0 = vrot.slane %v918_v52, 6  ;;  %1102 = vst [vmem:[#allocation1 + $0x1] ss:$4 sm:$0xff] %v907_v53  ;;  %v1717_v47 = vrot.slane %v918_v52, 7  ;;  %v559_v11 = vrot.slane %v519_v35, 2 }
 0x173   : > { %v912_v24 = vrot.slane %v911_v62, 2  ;;  %v2870_v54 = vsel %vm2623_vm9, %v1712_v28, %v1714_v21 }
 0x174   : > { %3585 = vst [vmem:[#allocation22_spill] sm:$0xff] %v2870_v54  ;;  %v1718_v22 = vor.u32 %v1717_v47, %v914_v27  ;;  %v921_v33 = vor.u32 %v920_v0, %v916_v29  ;;  %v2875_v58 = vsel %vm567_vm5, %v519_v35, %v559_v11  ;;  %v657_v16 = vsel %vm572_vm8, %v519_v35, %v559_v11 }
 0x175   : > { %v917_v49 = vsel %vm2617_vm6, %v912_v24, %v916_v29  ;;  %v2882_v21 = vrot.slane %v657_v16, 2  ;;  %v923_v25 = vshll.u32 %v2875_v58, 16  ;;  %v1721_v15 = vshrl.u32 %v2875_v58, 16 }
 0x176   : > { %1104 = vst [vmem:[#allocation1 + $0x2] ss:$4 sm:$0xff] %v917_v49  ;;  %v2880_v62 = vsel %vm2623_vm9, %v1716_v19, %v1718_v22  ;;  %v922_v27 = vrot.slane %v921_v33, 2  ;;  %v1720_v19 = vrot.slane %v1717_v47, 2 }
 0x177   : > { %v489_v43 = vpop.f32.mrf.mxu0  ;;  %3586 = vst [vmem:[#allocation23_spill] sm:$0xff] %v2880_v62  ;;  %v925_v24 = vrot.slane %v923_v25, 7  ;;  %v928_v29 = vshrl.u32 %v2882_v21, 16  ;;  %v931_v52 = vshll.u32 %v2882_v21, 16  ;;  %v1723_v35 = vrot.slane %v1721_v15, 7 }
 0x178   : > { %v520_v53 = vpack.c.bf16 %v489_v43, %v489_v43 }
 0x179   : > { %v926_v28 = vsel %vm2617_vm6, %v922_v27, %v925_v24  ;;  %v930_v0 = vrot.slane %v928_v29, 6  ;;  %v933_v11 = vrot.slane %v931_v52, 7  ;;  %v1724_v49 = vor.u32 %v1723_v35, %v923_v25 }
 0x17a   : > { %v560_v13 = vrot.slane %v520_v53, 2  ;;  %1106 = vst [vmem:[#allocation1 + $0x3] ss:$4 sm:$0xff] %v926_v28  ;;  %v2906_v62 = vrot.slane %v928_v29, 9 }
 0x17b   : > { %v934_v15 = vor.u32 %v933_v11, %v930_v0  ;;  %v2900_v57 = vsel %vm2623_vm9, %v1720_v19, %v1724_v49 }
 0x17c   : > { %v2889_v43 = vsel %vm567_vm5, %v520_v53, %v560_v13  ;;  %v664_v22 = vsel %vm572_vm8, %v520_v53, %v560_v13  ;;  %3587 = vst [vmem:[#allocation24_spill] sm:$0xff] %v2900_v57 }
 0x17d   : > { %v2894_v33 = vrot.slane %v664_v22, 2  ;;  %v936_v16 = vshll.u32 %v2889_v43, 16  ;;  %v940_v3 = vshrl.u32 %v2889_v43, 16  ;;  %v935_v24 = vrot.slane %v934_v15, 2  ;;  %3588 = vst [vmem:[#allocation25_spill] sm:$0xff] %v2906_v62 }
 0x17f   : > { %v492_v59 = vpop.f32.mrf.mxu0  ;;  %v938_v53 = vrot.slane %v936_v16, 7  ;;  %v942_v13 = vrot.slane %v940_v3, 6  ;;  %v946_v27 = vshll.u32 %v2894_v33, 16  ;;  %v950_v47 = vshrl.u32 %v2894_v33, 16 }
 0x180   : > { %v1728_v35 = vrot.slane %v940_v3, 7  ;;  %v521_v11 = vpack.c.bf16 %v492_v59, %v492_v59 }
 0x181   : > { %v943_v25 = vor.u32 %v942_v13, %v938_v53  ;;  %v948_v52 = vrot.slane %v946_v27, 7  ;;  %v939_v22 = vsel %vm2617_vm6, %v935_v24, %v938_v53  ;;  %v952_v28 = vrot.slane %v950_v47, 6  ;;  %v1115_v57 = vld.sshfl [vmem:[#allocation1] sm:$0xff pattern:$0x73625140] }
 0x182   : > { %v1732_v0 = vrot.slane %v950_v47, 7  ;;  %1108 = vst [vmem:[#allocation1 + $0x20] ss:$4 sm:$0xff] %v939_v22  ;;  %v2908_v49 = vor.u32 %v1728_v35, %v936_v16  ;;  %v1731_v54 = vrot.slane %v1728_v35, 2  ;;  %v561_v53 = vrot.slane %v521_v11, 2  ;;  %2343 = vmatmul.msk.bf16.gmra.mxu1 %vm1147_vm3, %v1115_v57 }
 0x183   : > { %v944_v19 = vrot.slane %v943_v25, 2  ;;  %v953_v59 = vor.u32 %v952_v28, %v948_v52 }
 0x184   : > { %3589 = vst [vmem:[#allocation26_spill] sm:$0xff] %v2908_v49  ;;  %v1733_v15 = vor.u32 %v1732_v0, %v946_v27  ;;  %v2922_v27 = vsel %vm567_vm5, %v521_v11, %v561_v53  ;;  %v671_v24 = vsel %vm572_vm8, %v521_v11, %v561_v53 }
 0x185   : > { %v949_v13 = vsel %vm2617_vm6, %v944_v19, %v948_v52  ;;  %v2925_v25 = vrot.slane %v671_v24, 2  ;;  %v955_v35 = vshll.u32 %v2922_v27, 16  ;;  %v959_v22 = vshrl.u32 %v2922_v27, 16 }
 0x186   : > { %1110 = vst [vmem:[#allocation1 + $0x21] ss:$4 sm:$0xff] %v949_v13  ;;  %v2919_v29 = vsel %vm2623_vm9, %v1731_v54, %v1733_v15  ;;  %v954_v52 = vrot.slane %v953_v59, 2 }
 0x187   : > { %3590 = vst [vmem:[#allocation27_spill] sm:$0xff] %v2919_v29  ;;  %v494_v16 = vpop.f32.mrf.mxu0  ;;  %v957_v28 = vrot.slane %v955_v35, 7  ;;  %v961_v19 = vrot.slane %v959_v22, 6  ;;  %v965_v54 = vshll.u32 %v2925_v25, 16  ;;  %v1736_v15 = vrot.slane %v959_v22, 7 }
 0x188   : > { %v522_v47 = vpack.c.bf16 %v494_v16, %v494_v16  ;;  %3591 = vst [vmem:[#allocation28_spill] sm:$0xff] %v2925_v25  ;;  %v1740_v13 = vshrl.u32 %v2925_v25, 16  ;;  %v1735_v16 = vrot.slane %v1732_v0, 2 }
 0x189   : > { %v958_v3 = vsel %vm2617_vm6, %v954_v52, %v957_v28  ;;  %v962_v11 = vor.u32 %v961_v19, %v957_v28  ;;  %v967_v24 = vrot.slane %v965_v54, 7  ;;  %v1737_v29 = vor.u32 %v1736_v15, %v955_v35 }
 0x18a   : > { %v562_v57 = vrot.slane %v522_v47, 2  ;;  %1112 = vst [vmem:[#allocation1 + $0x22] ss:$4 sm:$0xff] %v958_v3  ;;  %v1742_v49 = vrot.slane %v1740_v13, 7  ;;  %v1739_v28 = vrot.slane %v1736_v15, 2 }
 0x18b   : > { %v963_v59 = vrot.slane %v962_v11, 2  ;;  %v2941_v52 = vsel %vm2623_vm9, %v1735_v16, %v1737_v29 }
 0x18c   : > { %v2934_v53 = vsel %vm567_vm5, %v522_v47, %v562_v57  ;;  %v678_v62 = vsel %vm572_vm8, %v522_v47, %v562_v57  ;;  %3592 = vst [vmem:[#allocation29_spill] sm:$0xff] %v2941_v52  ;;  %v1743_v19 = vor.u32 %v1742_v49, %v965_v54 }
 0x18d   : > { %v969_v55 = vshrl.u32 %v2934_v53, 16  ;;  %v972_v22 = vshll.u32 %v2934_v53, 16  ;;  %v2943_v51 = vrot.slane %v678_v62, 2  ;;  %v968_v0 = vsel %vm2617_vm6, %v963_v59, %v967_v24 }
 0x18e   : > { %1114 = vst [vmem:[#allocation1 + $0x23] ss:$4 sm:$0xff] %v968_v0  ;;  %v2949_v47 = vsel %vm2623_vm9, %v1739_v28, %v1743_v19 }
 0x18f   : > { %v497_v39 = vpop.f32.mrf.mxu0  ;;  %v971_v3 = vrot.slane %v969_v55, 6  ;;  %v974_v35 = vrot.slane %v972_v22, 7  ;;  %3593 = vst [vmem:[#allocation30_spill] sm:$0xff] %v2949_v47  ;;  %v978_v57 = vshll.u32 %v2943_v51, 16  ;;  %v982_v13 = vshrl.u32 %v2943_v51, 16 }
 0x190   : > { %v523_v11 = vpack.c.bf16 %v497_v39, %v497_v39  ;;  %v2955_v59 = vrot.slane %v969_v55, 9 }
 0x191   : > { %v975_v29 = vor.u32 %v974_v35, %v971_v3  ;;  %v980_v15 = vrot.slane %v978_v57, 7  ;;  %v984_v49 = vrot.slane %v982_v13, 6  ;;  %v1747_v54 = vrot.slane %v982_v13, 7 }
 0x192   : > { %v563_v16 = vrot.slane %v523_v11, 2  ;;  %3594 = vst [vmem:[#allocation31_spill] sm:$0xff] %v2955_v59 }
 0x193   : > { %v976_v62 = vrot.slane %v975_v29, 2  ;;  %v985_v52 = vor.u32 %v984_v49, %v980_v15  ;;  %v2957_v22 = vor.u32 %v1747_v54, %v978_v57 }
 0x194   : > { %v2960_v28 = vsel %vm567_vm5, %v523_v11, %v563_v16  ;;  %v685_v39 = vsel %vm572_vm8, %v523_v11, %v563_v16 }
 0x195   : > { %v981_v24 = vsel %vm2617_vm6, %v976_v62, %v980_v15  ;;  %3595 = vst [vmem:[#allocation32_spill] sm:$0xff] %v2957_v22  ;;  %v987_v0 = vshll.u32 %v2960_v28, 16  ;;  %v991_v3 = vshrl.u32 %v2960_v28, 16  ;;  %v1116_v35 = vld.sshfl [vmem:[#allocation1 + $0x20] sm:$0xff pattern:$0x73625140] }
 0x196   : > { %1118 = vst [vmem:[#allocation1] ss:$4 sm:$0xff] %v981_v24  ;;  %v2969_v13 = vrot.slane %v685_v39, 2  ;;  %v986_v57 = vrot.slane %v985_v52, 2  ;;  %2344 = vmatmul.msk.bf16.vlgmr.msra.gmra.mxu3 %vm1147_vm3, %v1116_v35  ;;  %v1750_v24 = vrot.slane %v1747_v54, 2 }
 0x197   : > { %v499_v19 = vpop.f32.mrf.mxu0  ;;  %v989_v29 = vrot.slane %v987_v0, 7  ;;  %v993_v15 = vrot.slane %v991_v3, 6  ;;  %v1751_v49 = vrot.slane %v991_v3, 7 }
 0x198   : > { %v524_v62 = vpack.c.bf16 %v499_v19, %v499_v19  ;;  %v997_v11 = vshll.u32 %v2969_v13, 16  ;;  %v1001_v16 = vshrl.u32 %v2969_v13, 16 }
 0x199   : > { %v990_v47 = vsel %vm2617_vm6, %v986_v57, %v989_v29  ;;  %v994_v60 = vor.u32 %v993_v15, %v989_v29  ;;  %v1752_v25 = vor.u32 %v1751_v49, %v987_v0  ;;  %v1754_v35 = vrot.slane %v1751_v49, 2 }
 0x19a   : > { %v999_v55 = vrot.slane %v997_v11, 7  ;;  %v1003_v39 = vrot.slane %v1001_v16, 6  ;;  %1120 = vst [vmem:[#allocation1 + $0x1] ss:$4 sm:$0xff] %v990_v47  ;;  %v1755_v52 = vrot.slane %v1001_v16, 7  ;;  %v564_v19 = vrot.slane %v524_v62, 2 }
 0x19b   : > { %v995_v22 = vrot.slane %v994_v60, 2  ;;  %v2978_v3 = vsel %vm2623_vm9, %v1750_v24, %v1752_v25 }
 0x19c   : > { %3596 = vst [vmem:[#allocation33_spill] sm:$0xff] %v2978_v3  ;;  %v1756_v59 = vor.u32 %v1755_v52, %v997_v11  ;;  %v1004_v56 = vor.u32 %v1003_v39, %v999_v55  ;;  %v2983_v57 = vsel %vm567_vm5, %v524_v62, %v564_v19  ;;  %v692_v0 = vsel %vm572_vm8, %v524_v62, %v564_v19 }
 0x19d   : > { %v1000_v54 = vsel %vm2617_vm6, %v995_v22, %v999_v55  ;;  %v2990_v47 = vrot.slane %v692_v0, 2  ;;  %v1006_v25 = vshll.u32 %v2983_v57, 16  ;;  %v1759_v29 = vshrl.u32 %v2983_v57, 16 }
 0x19e   : > { %1122 = vst [vmem:[#allocation1 + $0x2] ss:$4 sm:$0xff] %v1000_v54  ;;  %v2988_v60 = vsel %vm2623_vm9, %v1754_v35, %v1756_v59  ;;  %v1005_v15 = vrot.slane %v1004_v56, 2  ;;  %v1758_v16 = vrot.slane %v1755_v52, 2 }
 0x19f   : > { %3597 = vst [vmem:[#allocation34_spill] sm:$0xff] %v2988_v60  ;;  %v1008_v49 = vrot.slane %v1006_v25, 7  ;;  %v1761_v11 = vrot.slane %v1759_v29, 7  ;;  %v1011_v55 = vshrl.u32 %v2990_v47, 16  ;;  %v1014_v62 = vshll.u32 %v2990_v47, 16  ;;  %v502_v35 = vpop.f32.mrf.mxu0 }
 0x1a0   : > { %v525_v56 = vpack.c.bf16 %v502_v35, %v502_v35 }
 0x1a1   : > { %v1009_v22 = vsel %vm2617_vm6, %v1005_v15, %v1008_v49  ;;  %v1762_v59 = vor.u32 %v1761_v11, %v1006_v25  ;;  %v1013_v39 = vrot.slane %v1011_v55, 6  ;;  %v1016_v19 = vrot.slane %v1014_v62, 7 }
 0x1a2   : > { %1124 = vst [vmem:[#allocation1 + $0x3] ss:$4 sm:$0xff] %v1009_v22  ;;  %v565_v29 = vrot.slane %v525_v56, 2 }
 0x1a3   : > { %v3000_v24 = vsel %vm2623_vm9, %v1758_v16, %v1762_v59  ;;  %v1017_v54 = vor.u32 %v1016_v19, %v1013_v39 }
 0x1a4   : > { %3598 = vst [vmem:[#allocation35_spill] sm:$0xff] %v3000_v24  ;;  %v3006_v52 = vsel %vm567_vm5, %v525_v56, %v565_v29  ;;  %v699_v25 = vsel %vm572_vm8, %v525_v56, %v565_v29  ;;  %v3019_v29 = vrot.slane %v1011_v55, 9 }
 0x1a5   : > { %v3010_v15 = vrot.slane %v699_v25, 2  ;;  %v1019_v49 = vshll.u32 %v3006_v52, 16  ;;  %v1023_v11 = vshrl.u32 %v3006_v52, 16  ;;  %v1018_v22 = vrot.slane %v1017_v54, 2 }
 0x1a6   : > { %3599 = vst [vmem:[#allocation36_spill] sm:$0xff] %v3019_v29 }
 0x1a7   : > { %v1021_v62 = vrot.slane %v1019_v49, 7  ;;  %v1025_v16 = vrot.slane %v1023_v11, 6  ;;  %v1029_v59 = vshll.u32 %v3010_v15, 16  ;;  %v1033_v39 = vshrl.u32 %v3010_v15, 16  ;;  %v504_v35 = vpop.f32.mrf.mxu0 }
 0x1a8   : > { %v1766_v19 = vrot.slane %v1023_v11, 7  ;;  %v526_v8 = vpack.c.bf16 %v504_v35, %v504_v35 }
 0x1a9   : > { %v1133_v0 = vld.sshfl [vmem:[#allocation1] sm:$0xff pattern:$0x73625140]  ;;  %v1022_v56 = vsel %vm2617_vm6, %v1018_v22, %v1021_v62  ;;  %v1031_v25 = vrot.slane %v1029_v59, 7  ;;  %v1035_v24 = vrot.slane %v1033_v39, 6  ;;  %v1770_v3 = vrot.slane %v1033_v39, 7 }
 0x1aa   : > { %1213 = vst [vmem:[#allocation1] ss:$4 sm:$0xff] %v2607_v17  ;;  %2345 = vmatmul.msk.bf16.gmra.mxu3 %vm1147_vm3, %v1133_v0  ;;  %v1026_v0 = vor.u32 %v1025_v16, %v1021_v62  ;;  %v3021_v54 = vor.u32 %v1766_v19, %v1019_v49  ;;  %v1769_v42 = vrot.slane %v1766_v19, 2  ;;  %v566_v22 = vrot.slane %v526_v8, 2 }
 0x1ab   : > { %1215 = vst [vmem:[#allocation1 + $0x1] ss:$4 sm:$0xff] %v2610_v20  ;;  %v1771_v7 = vor.u32 %v1770_v3, %v1029_v59  ;;  %v1036_v55 = vor.u32 %v1035_v24, %v1031_v25 }
 0x1ac   : > { %1217 = vst [vmem:[#allocation1 + $0x2] ss:$4 sm:$0xff] %v2633_v44  ;;  %v1027_v60 = vrot.slane %v1026_v0, 2  ;;  %v3036_v16 = vsel %vm567_vm5, %v526_v8, %v566_v22  ;;  %v706_v39 = vsel %vm572_vm8, %v526_v8, %v566_v22  ;;  %v1773_v22 = vrot.slane %v1770_v3, 2 }
 0x1ad   : > { %1219 = vst [vmem:[#allocation1 + $0x3] ss:$4 sm:$0xff] %v2643_v48  ;;  %v3033_v62 = vsel %vm2623_vm9, %v1769_v42, %v1771_v7  ;;  %v3040_v59 = vrot.slane %v706_v39, 2  ;;  %v1038_v24 = vshll.u32 %v3036_v16, 16  ;;  %v1042_v19 = vshrl.u32 %v3036_v16, 16 }
 0x1ae   : > { %1126 = vst [vmem:[#allocation1 + $0x20] ss:$4 sm:$0xff] %v1022_v56  ;;  %v1032_v49 = vsel %vm2617_vm6, %v1027_v60, %v1031_v25  ;;  %v1037_v60 = vrot.slane %v1036_v55, 2  ;;  %vm1337_vm5 = vcmask 1040384   ;;  %vm1338_vm8 = vcmask 1042434  }
 0x1af   : > { %3600 = vst [vmem:[#allocation37_spill] sm:$0xff] %v3021_v54  ;;  %v1040_v35 = vrot.slane %v1038_v24, 7  ;;  %v1044_v7 = vrot.slane %v1042_v19, 6  ;;  %v1774_v42 = vrot.slane %v1042_v19, 7  ;;  %v1778_v56 = vshrl.u32 %v3040_v59, 16  ;;  %vm1339_vm10 = vmor %vm1337_vm5, %vm1338_vm8 }
 0x1b0   : > { %3601 = vst [vmem:[#allocation38_spill] sm:$0xff] %v3033_v62  ;;  %v1048_v25 = vshll.u32 %v3040_v59, 16  ;;  %vm1341_vm12 = vmor %vm1339_vm10, %vm1340_vm11 }
 0x1b1   : > { %1128 = vst [vmem:[#allocation1 + $0x21] ss:$4 sm:$0xff] %v1032_v49  ;;  %v1041_v8 = vsel %vm2617_vm6, %v1037_v60, %v1040_v35  ;;  %v1045_v0 = vor.u32 %v1044_v7, %v1040_v35  ;;  %v1775_v39 = vor.u32 %v1774_v42, %v1038_v24  ;;  %v1780_v11 = vrot.slane %v1778_v56, 7  ;;  %v2433_v24 = vld [vmem:[%s3539_s2 + $0x8] sm:$0xff]  ;;  %vm3087_vm14 = vmor %vm1341_vm12, %vm1342_vm13 }
 0x1b2   : > { %1130 = vst [vmem:[#allocation1 + $0x22] ss:$4 sm:$0xff] %v1041_v8  ;;  %v1777_v55 = vrot.slane %v1774_v42, 2  ;;  %v1050_v29 = vrot.slane %v1048_v25, 7  ;;  %1294 = vmatpush.bf16.msrb.mxu0 %v2433_v24  ;;  %2444 = vmatpush.bf16.msra.mxu2 %v2433_v24  ;;  %v1352_v35 = vrot.slane %v2643_v48, 7  ;;  %v2363_v7 = vrot.slane %v2607_v17, 9 }
 0x1b3   : > { %v1046_v62 = vrot.slane %v1045_v0, 2  ;;  %v3051_v49 = vsel %vm2623_vm9, %v1773_v22, %v1775_v39  ;;  %v1781_v54 = vor.u32 %v1780_v11, %v1048_v25  ;;  %v1349_v11 = vrot.slane %v2633_v44, 7 }
 0x1b4   : > { %v1228_v5 = vld.sshfl [vmem:[#allocation1] sm:$0xff pattern:$0x73625140]  ;;  %v1355_v8 = vrot.slane %v2663_v10, 7  ;;  %v1354_v39 = vrot.slane %v1352_v35, 2  ;;  %v1375_v24 = vrot.slane %v2738_v1, 7 }
 0x1b5   : > { %1230 = vst [vmem:[#allocation1] ss:$4 sm:$0xff] %v2718_v38  ;;  %v3058_v60 = vsel %vm2623_vm9, %v1777_v55, %v1781_v54  ;;  %v1051_v3 = vsel %vm2617_vm6, %v1046_v62, %v1050_v29  ;;  %v2432_v54 = vld [vmem:[%s3539_s2] sm:$0xff]  ;;  %v1351_v42 = vrot.slane %v1349_v11, 2 }
 0x1b6   : > { %1231 = vst [vmem:[#allocation1 + $0x1] ss:$4 sm:$0xff] %v2725_v30  ;;  %1295 = vmatpush.bf16.msrb.mxu0 %v2432_v54  ;;  %2445 = vmatpush.bf16.msra.mxu2 %v2432_v54  ;;  %v1356_v17 = vsel %vm3087_vm14, %v1354_v39, %v1355_v8  ;;  %v1372_v54 = vrot.slane %v2725_v30, 7 }
 0x1b7   : > { %1232 = vst [vmem:[#allocation1 + $0x2] ss:$4 sm:$0xff] %v2738_v1  ;;  %v1353_v55 = vsel %vm3087_vm14, %v1351_v42, %v1352_v35 }
 0x1b8   : > { %1233 = vst [vmem:[#allocation1 + $0x3] ss:$4 sm:$0xff] %v2745_v14  ;;  %v1374_v35 = vrot.slane %v1372_v54, 2 }
 0x1b9   : > { %1132 = vst [vmem:[#allocation1 + $0x23] ss:$4 sm:$0xff] %v1051_v3  ;;  %2355 = vmatmul.msk.bf16.vlgmr.msrb.gmra.mxu0 %vm1147_vm3, %v1228_v5  ;;  %v1346_v5 = vrot.slane %v2610_v20, 7 }
 0x1ba   : > { %v1376_v8 = vsel %vm3087_vm14, %v1374_v35, %v1375_v24  ;;  %v1407_v35 = vrot.slane %v2875_v58, 7 }
 0x1bb   : > { %v1348_v56 = vrot.slane %v1346_v5, 2  ;;  %v1347_v0 = vsel %vm3087_vm14, %v2363_v7, %v1346_v5  ;;  %v1377_v5 = vrot.slane %v1375_v24, 2  ;;  %v1381_v7 = vrot.slane %v2771_v61, 7 }
 0x1bc   : > { %v1398_v24 = vrot.slane %v2835_v18, 7 }
 0x1bd   : > { %v1350_v22 = vsel %vm3087_vm14, %v1348_v56, %v1349_v11  ;;  %v2365_v11 = vrot.slane %v2718_v38, 9 }
 0x1bf   : > { %v3053_v19 = vld.sshfl [vmem:[#allocation1] sm:$0xff pattern:$0x73625140]  ;;  %v1373_v42 = vsel %vm3087_vm14, %v2365_v11, %v1372_v54  ;;  %v1404_v54 = vrot.slane %v2861_v23, 7 }
 0x1c0   : > { %1240 = vst [vmem:[#allocation1] ss:$4 sm:$0xff] %v2826_v26  ;;  %v1134_v29 = vld.sshfl [vmem:[#allocation1 + $0x20] sm:$0xff pattern:$0x73625140] }
 0x1c1   : > { %1241 = vst [vmem:[#allocation1 + $0x1] ss:$4 sm:$0xff] %v2835_v18  ;;  %2346 = vmatmul.msk.bf16.gmra.mxu3 %vm1147_vm3, %v1134_v29  ;;  %v1378_v29 = vrot.slane %v2745_v14, 7 }
 0x1c2   : > { %1242 = vst [vmem:[#allocation1 + $0x2] ss:$4 sm:$0xff] %v2852_v63 }
 0x1c3   : > { %1243 = vst [vmem:[#allocation1 + $0x3] ss:$4 sm:$0xff] %v2861_v23  ;;  %v1379_v38 = vsel %vm3087_vm14, %v1377_v5, %v1378_v29  ;;  %v1400_v5 = vrot.slane %v1398_v24, 2 }
 0x1c4   : > { %1221 = vst [vmem:[#allocation1 + $0x20] ss:$4 sm:$0xff] %v2666_v12 }
 0x1c5   : > { %1223 = vst [vmem:[#allocation1 + $0x21] ss:$4 sm:$0xff] %v2675_v32 }
 0x1c6   : > { %1225 = vst [vmem:[#allocation1 + $0x22] ss:$4 sm:$0xff] %v2678_v36 }
 0x1c7   : > { %1227 = vst [vmem:[#allocation1 + $0x23] ss:$4 sm:$0xff] %v2706_v4 }
 0x1ca   : > { %v3071_v31 = vld.sshfl [vmem:[#allocation1] sm:$0xff pattern:$0x73625140] }
 0x1cb   : > { %1250 = vst [vmem:[#allocation1] ss:$4 sm:$0xff] %v2934_v53 }
 0x1cc   : > { %1251 = vst [vmem:[#allocation1 + $0x1] ss:$4 sm:$0xff] %v2943_v51 }
 0x1cd   : > { %1252 = vst [vmem:[#allocation1 + $0x2] ss:$4 sm:$0xff] %v2960_v28 }
 0x1ce   : > { %1253 = vst [vmem:[#allocation1 + $0x3] ss:$4 sm:$0xff] %v2969_v13  ;;  %v1229_v3 = vld.sshfl [vmem:[#allocation1 + $0x20] sm:$0xff pattern:$0x73625140] }
 0x1cf   : > { %1234 = vst [vmem:[#allocation1 + $0x20] ss:$4 sm:$0xff] %v2774_v2  ;;  %2356 = vmatmul.msk.bf16.gmra.mxu0 %vm1147_vm3, %v1229_v3  ;;  %v2436_v3 = vld [vmem:[%s3539_s2 + $0x20] sm:$0xff] }
 0x1d0   : > { %1235 = vst [vmem:[#allocation1 + $0x21] ss:$4 sm:$0xff] %v2783_v34 }
 0x1d1   : > { %1236 = vst [vmem:[#allocation1 + $0x22] ss:$4 sm:$0xff] %v2786_v46 }
 0x1d2   : > { %1237 = vst [vmem:[#allocation1 + $0x23] ss:$4 sm:$0xff] %v2814_v50 }
 0x1d5   : > { %v3097_v25 = vld.sshfl [vmem:[#allocation1] sm:$0xff pattern:$0x73625140] }
 0x1d6   : > { %1453 = vst [vmem:[#allocation1] ss:$4 sm:$0xff] %v1347_v0  ;;  %v1380_v0 = vrot.slane %v1378_v29, 2  ;;  %v2367_v29 = vrot.slane %v2826_v26, 9 }
 0x1d7   : > { %1456 = vst [vmem:[#allocation1 + $0x1] ss:$4 sm:$0xff] %v1350_v22  ;;  %v2437_v22 = vld [vmem:[%s3539_s2 + $0x28] sm:$0xff] }
 0x1d8   : > { %1459 = vst [vmem:[#allocation1 + $0x2] ss:$4 sm:$0xff] %v1353_v55  ;;  %v1382_v39 = vsel %vm3087_vm14, %v1380_v0, %v1381_v7  ;;  %1565 = vmatpush.bf16.msrb.mxu3 %v2437_v22  ;;  %v1399_v7 = vsel %vm3087_vm14, %v2367_v29, %v1398_v24  ;;  %v1406_v0 = vrot.slane %v1404_v54, 2  ;;  %v1427_v22 = vrot.slane %v2960_v28, 7 }
 0x1d9   : > { %1462 = vst [vmem:[#allocation1 + $0x3] ss:$4 sm:$0xff] %v1356_v17  ;;  %v1239_v55 = vld.sshfl [vmem:[#allocation1 + $0x20] sm:$0xff pattern:$0x73625140]  ;;  %v1401_v17 = vrot.slane %v2852_v63, 7 }
 0x1da   : > { %1244 = vst [vmem:[#allocation1 + $0x20] ss:$4 sm:$0xff] %v2882_v21  ;;  %2358 = vmatmul.msk.bf16.vlgmr.msra.gmra.mxu2 %vm1147_vm3, %v1239_v55  ;;  %v1430_v55 = vrot.slane %v2969_v13, 7  ;;  %v1365_v24 = vrot.slane %v2706_v4, 7  ;;  %v1433_v29 = vrot.slane %v2983_v57, 7 }
 0x1db   : > { %1245 = vst [vmem:[#allocation1 + $0x21] ss:$4 sm:$0xff] %v2889_v43  ;;  %v1403_v11 = vrot.slane %v1401_v17, 2 }
 0x1dc   : > { %1246 = vst [vmem:[#allocation1 + $0x22] ss:$4 sm:$0xff] %v2894_v33  ;;  %1566 = vmatpush.bf16.msrb.mxu3 %v2436_v3  ;;  %v1429_v3 = vrot.slane %v1427_v22, 2 }
 0x1dd   : > { %1247 = vst [vmem:[#allocation1 + $0x23] ss:$4 sm:$0xff] %v2922_v27  ;;  %v1405_v26 = vsel %vm3087_vm14, %v1403_v11, %v1404_v54  ;;  %v1362_v11 = vrot.slane %v2678_v36, 7 }
 0x1df   : > { %2357 = vmatmul.msk.bf16.gmra.mxu0 %vm1147_vm3, %v3053_v19  ;;  %v1364_v4 = vrot.slane %v1362_v11, 2 }
 0x1e0   : > { %v1475_v56 = vld.sshfl [vmem:[#allocation1] sm:$0xff pattern:$0x73625140] }
 0x1e1   : > { %1478 = vst [vmem:[#allocation1] ss:$4 sm:$0xff] %v1373_v42  ;;  %2379 = vmatmul.msk.bf16.vlgmr.msrb.gmra.mxu3 %vm1147_vm3, %v1475_v56  ;;  %v1408_v56 = vsel %vm3087_vm14, %v1406_v0, %v1407_v35  ;;  %v2364_v0 = vrot.slane %v2666_v12, 9 }
 0x1e2   : > { %1480 = vst [vmem:[#allocation1 + $0x1] ss:$4 sm:$0xff] %v1376_v8  ;;  %v1402_v8 = vsel %vm3087_vm14, %v1400_v5, %v1401_v17  ;;  %v2369_v17 = vrot.slane %v2934_v53, 9 }
 0x1e3   : > { %1482 = vst [vmem:[#allocation1 + $0x2] ss:$4 sm:$0xff] %v1379_v38  ;;  %v1424_v38 = vrot.slane %v2943_v51, 7 }
 0x1e4   : > { %1484 = vst [vmem:[#allocation1 + $0x3] ss:$4 sm:$0xff] %v1382_v39  ;;  %v1249_v19 = vld.sshfl [vmem:[#allocation1 + $0x20] sm:$0xff pattern:$0x73625140]  ;;  %v1359_v39 = vrot.slane %v2675_v32, 7 }
 0x1e5   : > { %1254 = vst [vmem:[#allocation1 + $0x20] ss:$4 sm:$0xff] %v2990_v47  ;;  %v1426_v54 = vrot.slane %v1424_v38, 2  ;;  %v1425_v5 = vsel %vm3087_vm14, %v2369_v17, %v1424_v38 }
 0x1e6   : > { %1255 = vst [vmem:[#allocation1 + $0x21] ss:$4 sm:$0xff] %v3006_v52  ;;  %v1360_v17 = vsel %vm3087_vm14, %v2364_v0, %v1359_v39  ;;  %v1394_v0 = vrot.slane %v2817_v45, 7 }
 0x1e7   : > { %1256 = vst [vmem:[#allocation1 + $0x22] ss:$4 sm:$0xff] %v3010_v15  ;;  %v1428_v53 = vsel %vm3087_vm14, %v1426_v54, %v1427_v22  ;;  %v1385_v54 = vrot.slane %v2783_v34, 7 }
 0x1e8   : > { %1257 = vst [vmem:[#allocation1 + $0x23] ss:$4 sm:$0xff] %v3036_v16 }
 0x1ea   : > { %2359 = vmatmul.msk.bf16.gmra.mxu2 %vm1147_vm3, %v3071_v31  ;;  %v1367_v31 = vrot.slane %v1365_v24, 2 }
 0x1eb   : > { %v3144_v42 = vld.sshfl [vmem:[#allocation1] sm:$0xff pattern:$0x73625140] }
 0x1ec   : > { %1496 = vst [vmem:[#allocation1] ss:$4 sm:$0xff] %v1399_v7  ;;  %v1361_v7 = vrot.slane %v1359_v39, 2  ;;  %v1388_v39 = vrot.slane %v2786_v46, 7 }
 0x1ed   : > { %1498 = vst [vmem:[#allocation1 + $0x1] ss:$4 sm:$0xff] %v1402_v8  ;;  %v1432_v8 = vrot.slane %v1430_v55, 2 }
 0x1ee   : > { %1500 = vst [vmem:[#allocation1 + $0x2] ss:$4 sm:$0xff] %v1405_v26  ;;  %v1431_v26 = vsel %vm3087_vm14, %v1429_v3, %v1430_v55  ;;  %v1363_v12 = vsel %vm3087_vm14, %v1361_v7, %v1362_v11  ;;  %v1366_v55 = vsel %vm3087_vm14, %v1364_v4, %v1365_v24  ;;  %v2439_v11 = vld [vmem:[%s3539_s2 + $0x38] sm:$0xff]  ;;  %v1387_v7 = vrot.slane %v1385_v54, 2 }
 0x1ef   : > { %1502 = vst [vmem:[#allocation1 + $0x3] ss:$4 sm:$0xff] %v1408_v56  ;;  %v1368_v56 = vrot.slane %v2709_v9, 7  ;;  %v1434_v38 = vsel %vm3087_vm14, %v1432_v8, %v1433_v29  ;;  %v3180_v22 = vld.sshfl [vmem:[#allocation1 + $0x20] sm:$0xff pattern:$0x73625140]  ;;  %v3604_v4 = vsel %vm2623_vm9, %v2627_v40, %v2629_v41  ;;  %1900 = vmatpush.bf16.msrb.mxu1 %v2439_v11 }
 0x1f0   : > { %1465 = vst [vmem:[#allocation1 + $0x20] ss:$4 sm:$0xff] %v1360_v17  ;;  %v1391_v29 = vrot.slane %v2814_v50, 7  ;;  %v2366_v24 = vrot.slane %v2774_v2, 9  ;;  %v2438_v40 = vld [vmem:[%s3539_s2 + $0x30] sm:$0xff]  ;;  %v1389_v41 = vsel %vm3087_vm14, %v1387_v7, %v1388_v39  ;;  %v1417_v17 = vrot.slane %v2922_v27, 7 }
 0x1f1   : > { %1468 = vst [vmem:[#allocation1 + $0x21] ss:$4 sm:$0xff] %v1363_v12  ;;  %v1369_v3 = vsel %vm3087_vm14, %v1367_v31, %v1368_v56  ;;  %v3606_v56 = vld [vmem:[#allocation3_spill] sm:$0xff]  ;;  %v1414_v12 = vrot.slane %v2894_v33, 7  ;;  %v2368_v11 = vrot.slane %v2882_v21, 9  ;;  %v3610_v7 = vld [vmem:[#allocation12_spill] sm:$0xff] }
 0x1f2   : > { %1471 = vst [vmem:[#allocation1 + $0x22] ss:$4 sm:$0xff] %v1366_v55  ;;  %v1393_v8 = vrot.slane %v1391_v29, 2  ;;  %v1386_v31 = vsel %vm3087_vm14, %v2366_v24, %v1385_v54  ;;  %v3607_v54 = vld [vmem:[#allocation10_spill] sm:$0xff]  ;;  %v3611_v24 = vld [vmem:[#allocation28_spill] sm:$0xff] }
 0x1f3   : > { %1474 = vst [vmem:[#allocation1 + $0x23] ss:$4 sm:$0xff] %v1369_v3  ;;  %1901 = vmatpush.bf16.msrb.mxu1 %v2438_v40 }
 0x1f4   : > { %v1395_v2 = vsel %vm3087_vm14, %v1393_v8, %v1394_v0  ;;  %v3612_v8 = vld [vmem:[#allocation13_spill] sm:$0xff] }
 0x1f6   : > { %v3168_v35 = vld.sshfl [vmem:[#allocation1] sm:$0xff pattern:$0x73625140] }
 0x1f7   : > { %1514 = vst [vmem:[#allocation1] ss:$4 sm:$0xff] %v1425_v5 }
 0x1f8   : > { %1516 = vst [vmem:[#allocation1 + $0x1] ss:$4 sm:$0xff] %v1428_v53  ;;  %v1390_v53 = vrot.slane %v1388_v39, 2  ;;  %v3608_v39 = vld [vmem:[#allocation11_spill] sm:$0xff] }
 0x1f9   : > { %1518 = vst [vmem:[#allocation1 + $0x2] ss:$4 sm:$0xff] %v1431_v26  ;;  %v3605_v26 = vld [vmem:[#allocation2_spill] sm:$0xff] }
 0x1fa   : > { %1520 = vst [vmem:[#allocation1 + $0x3] ss:$4 sm:$0xff] %v1434_v38  ;;  %v1476_v38 = vld.sshfl [vmem:[#allocation1 + $0x20] sm:$0xff pattern:$0x73625140]  ;;  %2360 = vmatmul.msk.bf16.gmra.mxu2 %vm1147_vm3, %v1249_v19  ;;  %v1411_v19 = vrot.slane %v2889_v43, 7 }
 0x1fb   : > { %1486 = vst [vmem:[#allocation1 + $0x20] ss:$4 sm:$0xff] %v1386_v31  ;;  %2380 = vmatmul.msk.bf16.gmra.mxu3 %vm1147_vm3, %v1476_v38  ;;  %v3613_v31 = vld [vmem:[#allocation14_spill] sm:$0xff] }
 0x1fc   : > { %1488 = vst [vmem:[#allocation1 + $0x21] ss:$4 sm:$0xff] %v1389_v41  ;;  %v1413_v3 = vrot.slane %v1411_v19, 2  ;;  %v1412_v0 = vsel %vm3087_vm14, %v2368_v11, %v1411_v19  ;;  %v1437_v41 = vrot.slane %v3006_v52, 7  ;;  %v1440_v19 = vrot.slane %v3010_v15, 7  ;;  %v3619_v11 = vld [vmem:[#allocation24_spill] sm:$0xff] }
 0x1fd   : > { %1492 = vst [vmem:[#allocation1 + $0x23] ss:$4 sm:$0xff] %v1395_v2 }
 0x1fe   : > { %v1415_v38 = vsel %vm3087_vm14, %v1413_v3, %v1414_v12  ;;  %v1439_v3 = vrot.slane %v1437_v41, 2 }
 0x201   : > { %v3191_v5 = vld.sshfl [vmem:[#allocation1] sm:$0xff pattern:$0x73625140] }
 0x202   : > { %1788 = vst [vmem:[#allocation1] ss:$4 sm:$0xff] %v3604_v4  ;;  %v1419_v4 = vrot.slane %v1417_v17, 2 }
 0x203   : > { %1791 = vst [vmem:[#allocation1 + $0x1] ss:$4 sm:$0xff] %v2654_v6  ;;  %v1392_v6 = vsel %vm3087_vm14, %v1390_v53, %v1391_v29  ;;  %v3609_v29 = vsel %vm2623_vm9, %v3607_v54, %v3608_v39  ;;  %v1420_v53 = vrot.slane %v3611_v24, 7  ;;  %v2370_v54 = vrot.slane %v2990_v47, 9  ;;  %v3617_v39 = vld [vmem:[#allocation22_spill] sm:$0xff] }
 0x204   : > { %1794 = vst [vmem:[#allocation1 + $0x2] ss:$4 sm:$0xff] %v3605_v26  ;;  %v1416_v26 = vrot.slane %v1414_v12, 2  ;;  %v3615_v12 = vld [vmem:[#allocation21_spill] sm:$0xff] }
 0x205   : > { %1797 = vst [vmem:[#allocation1 + $0x3] ss:$4 sm:$0xff] %v3606_v56  ;;  %v1421_v40 = vsel %vm3087_vm14, %v1419_v4, %v1420_v53  ;;  %v1442_v4 = vrot.slane %v1440_v19, 2 }
 0x206   : > { %1490 = vst [vmem:[#allocation1 + $0x22] ss:$4 sm:$0xff] %v1392_v6  ;;  %v1418_v21 = vsel %vm3087_vm14, %v1416_v26, %v1417_v17  ;;  %v1443_v6 = vrot.slane %v3036_v16, 7  ;;  %v3614_v17 = vld [vmem:[#allocation20_spill] sm:$0xff] }
 0x208   : > { %v1444_v47 = vsel %vm3087_vm14, %v1442_v4, %v1443_v6 }
 0x20a   : > { %2361 = vmatmul.msk.bf16.gmra.mxu2 %vm1147_vm3, %v3097_v25  ;;  %v3618_v25 = vld [vmem:[#allocation23_spill] sm:$0xff] }
 0x20b   : > { %2381 = vmatmul.msk.bf16.gmra.mxu3 %vm1147_vm3, %v3144_v42  ;;  %v1446_v42 = vrot.slane %v3040_v59, 7 }
 0x20c   : > { %v1810_v55 = vld.sshfl [vmem:[#allocation1] sm:$0xff pattern:$0x73625140] }
 0x20d   : > { %1813 = vst [vmem:[#allocation1] ss:$4 sm:$0xff] %v3609_v29  ;;  %2403 = vmatmul.msk.bf16.vlgmr.msrb.gmra.mxu1 %vm1147_vm3, %v1810_v55  ;;  %v1494_v56 = vld.sshfl [vmem:[#allocation1 + $0x20] sm:$0xff pattern:$0x73625140]  ;;  %v3616_v55 = vsel %vm2623_vm9, %v3614_v17, %v3615_v12  ;;  %v1445_v29 = vrot.slane %v1443_v6, 2 }
 0x20e   : > { %1815 = vst [vmem:[#allocation1 + $0x1] ss:$4 sm:$0xff] %v3610_v7  ;;  %v1438_v7 = vsel %vm3087_vm14, %v2370_v54, %v1437_v41  ;;  %v3624_v41 = vld [vmem:[#allocation34_spill] sm:$0xff]  ;;  %v3625_v6 = vld [vmem:[#allocation35_spill] sm:$0xff]  ;;  %v3627_v17 = vld [vmem:[#allocation5_spill] sm:$0xff] }
 0x20f   : > { %1817 = vst [vmem:[#allocation1 + $0x2] ss:$4 sm:$0xff] %v3612_v8  ;;  %v1441_v8 = vsel %vm3087_vm14, %v1439_v3, %v1440_v19  ;;  %v3626_v19 = vld [vmem:[#allocation4_spill] sm:$0xff]  ;;  %v3631_v54 = vld [vmem:[#allocation9_spill] sm:$0xff] }
 0x210   : > { %1819 = vst [vmem:[#allocation1 + $0x3] ss:$4 sm:$0xff] %v3613_v31  ;;  %v3620_v31 = vld [vmem:[#allocation31_spill] sm:$0xff]  ;;  %v3628_v12 = vsel %vm2623_vm9, %v3626_v19, %v3627_v17  ;;  %v3630_v3 = vld [vmem:[#allocation8_spill] sm:$0xff]  ;;  %v3647_v19 = vld [vmem:[#allocation38_spill] sm:$0xff] }
 0x211   : > { %1504 = vst [vmem:[#allocation1 + $0x20] ss:$4 sm:$0xff] %v1412_v0  ;;  %v1447_v0 = vsel %vm3087_vm14, %v1445_v29, %v1446_v42  ;;  %v2440_v29 = vld [vmem:[%s3539_s2 + $0x40] sm:$0xff]  ;;  %v3632_v42 = vld [vmem:[#allocation15_spill] sm:$0xff] }
 0x212   : > { %1506 = vst [vmem:[#allocation1 + $0x21] ss:$4 sm:$0xff] %v1415_v38  ;;  %v3621_v38 = vld [vmem:[#allocation32_spill] sm:$0xff] }
 0x213   : > { %1508 = vst [vmem:[#allocation1 + $0x22] ss:$4 sm:$0xff] %v1418_v21  ;;  %v3622_v21 = vsel %vm2623_vm9, %v3620_v31, %v3621_v38  ;;  %v3642_v38 = vld [vmem:[#allocation29_spill] sm:$0xff] }
 0x214   : > { %1510 = vst [vmem:[#allocation1 + $0x23] ss:$4 sm:$0xff] %v1421_v40  ;;  %v3623_v40 = vld [vmem:[#allocation33_spill] sm:$0xff] }
 0x217   : > { %v3247_v2 = vld.sshfl [vmem:[#allocation1] sm:$0xff pattern:$0x73625140] }
 0x218   : > { %1831 = vst [vmem:[#allocation1] ss:$4 sm:$0xff] %v3616_v55  ;;  %v3629_v55 = vld [vmem:[#allocation6_spill] sm:$0xff] }
 0x219   : > { %1833 = vst [vmem:[#allocation1 + $0x1] ss:$4 sm:$0xff] %v3617_v39 }
 0x21a   : > { %1835 = vst [vmem:[#allocation1 + $0x2] ss:$4 sm:$0xff] %v3618_v25  ;;  %2362 = vmatmul.msk.bf16.gmra.mxu2 %vm1147_vm3, %v3180_v22  ;;  %v2441_v22 = vld [vmem:[%s3539_s2 + $0x48] sm:$0xff] }
 0x21b   : > { %1837 = vst [vmem:[#allocation1 + $0x3] ss:$4 sm:$0xff] %v3619_v11  ;;  %v1512_v53 = vld.sshfl [vmem:[#allocation1 + $0x20] sm:$0xff pattern:$0x73625140]  ;;  %2382 = vmatmul.msk.bf16.gmra.mxu3 %vm1147_vm3, %v1494_v56  ;;  %v3297_v56 = vpop.f32.mrf.mxu1  ;;  %2044 = vmatpush.bf16.msrb.mxu2 %v2441_v22  ;;  %v3633_v11 = vld [vmem:[#allocation16_spill] sm:$0xff] }
 0x21c   : > { %1522 = vst [vmem:[#allocation1 + $0x20] ss:$4 sm:$0xff] %v1438_v7  ;;  %v3634_v7 = vsel %vm2623_vm9, %v3632_v42, %v3633_v11 }
 0x21d   : > { %1524 = vst [vmem:[#allocation1 + $0x21] ss:$4 sm:$0xff] %v1441_v8 }
 0x21e   : > { %1526 = vst [vmem:[#allocation1 + $0x22] ss:$4 sm:$0xff] %v1444_v47  ;;  %v3638_v47 = vld [vmem:[#allocation25_spill] sm:$0xff] }
 0x21f   : > { %1528 = vst [vmem:[#allocation1 + $0x23] ss:$4 sm:$0xff] %v1447_v0  ;;  %2045 = vmatpush.bf16.msrb.mxu2 %v2440_v29  ;;  %v3639_v0 = vld [vmem:[#allocation26_spill] sm:$0xff] }
 0x220   : > { %v3640_v31 = vsel %vm2623_vm9, %v3638_v47, %v3639_v0 }
 0x222   : > { %v3268_v26 = vld.sshfl [vmem:[#allocation1] sm:$0xff pattern:$0x73625140] }
 0x223   : > { %1849 = vst [vmem:[#allocation1] ss:$4 sm:$0xff] %v3622_v21  ;;  %v3643_v21 = vld [vmem:[#allocation30_spill] sm:$0xff] }
 0x224   : > { %1851 = vst [vmem:[#allocation1 + $0x1] ss:$4 sm:$0xff] %v3623_v40  ;;  %v3644_v40 = vld [vmem:[#allocation36_spill] sm:$0xff] }
 0x225   : > { %1853 = vst [vmem:[#allocation1 + $0x2] ss:$4 sm:$0xff] %v3624_v41  ;;  %v3645_v41 = vld [vmem:[#allocation37_spill] sm:$0xff] }
 0x226   : > { %1855 = vst [vmem:[#allocation1 + $0x3] ss:$4 sm:$0xff] %v3625_v6  ;;  %v3280_v62 = vld.sshfl [vmem:[#allocation1 + $0x20] sm:$0xff pattern:$0x73625140]  ;;  %v3646_v6 = vsel %vm2623_vm9, %v3644_v40, %v3645_v41 }
 0x227   : > { %1800 = vst [vmem:[#allocation1 + $0x20] ss:$4 sm:$0xff] %v3628_v12 }
 0x228   : > { %1803 = vst [vmem:[#allocation1 + $0x21] ss:$4 sm:$0xff] %v3629_v55 }
 0x229   : > { %1806 = vst [vmem:[#allocation1 + $0x22] ss:$4 sm:$0xff] %v3630_v3 }
 0x22a   : > { %1809 = vst [vmem:[#allocation1 + $0x23] ss:$4 sm:$0xff] %v3631_v54 }
 0x22b   : > { %2383 = vmatmul.msk.bf16.gmra.mxu3 %vm1147_vm3, %v3168_v35  ;;  %v3641_v35 = vld [vmem:[#allocation27_spill] sm:$0xff] }
 0x22d   : > { %v3291_v39 = vld.sshfl [vmem:[#allocation1] sm:$0xff pattern:$0x73625140] }
 0x22e   : > { %1963 = vst [vmem:[#allocation1] ss:$4 sm:$0xff] %v2610_v20  ;;  %v3635_v20 = vld [vmem:[#allocation17_spill] sm:$0xff] }
 0x22f   : > { %1965 = vst [vmem:[#allocation1 + $0x1] ss:$4 sm:$0xff] %v2633_v44  ;;  %v3636_v44 = vld [vmem:[#allocation18_spill] sm:$0xff] }
 0x230   : > { %1967 = vst [vmem:[#allocation1 + $0x2] ss:$4 sm:$0xff] %v2643_v48  ;;  %v3637_v48 = vld [vmem:[#allocation19_spill] sm:$0xff] }
 0x231   : > { %1969 = vst [vmem:[#allocation1 + $0x3] ss:$4 sm:$0xff] %v2663_v10  ;;  %v1811_v25 = vld.sshfl [vmem:[#allocation1 + $0x20] sm:$0xff pattern:$0x73625140]  ;;  %v3316_v10 = vpop.f32.mrf.mxu1 }
 0x232   : > { %1821 = vst [vmem:[#allocation1 + $0x20] ss:$4 sm:$0xff] %v3634_v7  ;;  %2404 = vmatmul.msk.bf16.gmra.mxu1 %vm1147_vm3, %v1811_v25 }
 0x233   : > { %1823 = vst [vmem:[#allocation1 + $0x21] ss:$4 sm:$0xff] %v3635_v20 }
 0x234   : > { %1825 = vst [vmem:[#allocation1 + $0x22] ss:$4 sm:$0xff] %v3636_v44 }
 0x235   : > { %1827 = vst [vmem:[#allocation1 + $0x23] ss:$4 sm:$0xff] %v3637_v48 }
 0x238   : > { %v1978_v4 = vld.sshfl [vmem:[#allocation1] sm:$0xff pattern:$0x73625140] }
 0x239   : > { %2419 = vmatmul.msk.bf16.vlgmr.msrb.gmra.mxu2 %vm1147_vm3, %v1978_v4  ;;  %1980 = vst [vmem:[#allocation1] ss:$4 sm:$0xff] %v2725_v30  ;;  %v3331_v30 = vpop.f32.mrf.mxu1 }
 0x23a   : > { %1981 = vst [vmem:[#allocation1 + $0x1] ss:$4 sm:$0xff] %v2738_v1  ;;  %v3333_v1 = vpop.f32.mrf.mxu3 }
 0x23b   : > { %1982 = vst [vmem:[#allocation1 + $0x2] ss:$4 sm:$0xff] %v2745_v14  ;;  %2384 = vmatmul.msk.bf16.gmra.mxu3 %vm1147_vm3, %v1512_v53 }
 0x23c   : > { %v1829_v8 = vld.sshfl [vmem:[#allocation1 + $0x20] sm:$0xff pattern:$0x73625140]  ;;  %1983 = vst [vmem:[#allocation1 + $0x3] ss:$4 sm:$0xff] %v2771_v61 }
 0x23d   : > { %1839 = vst [vmem:[#allocation1 + $0x20] ss:$4 sm:$0xff] %v3640_v31 }
 0x23e   : > { %1841 = vst [vmem:[#allocation1 + $0x21] ss:$4 sm:$0xff] %v3641_v35 }
 0x23f   : > { %1843 = vst [vmem:[#allocation1 + $0x22] ss:$4 sm:$0xff] %v3642_v38 }
 0x240   : > { %1845 = vst [vmem:[#allocation1 + $0x23] ss:$4 sm:$0xff] %v3643_v21 }
 0x242   : > { %2405 = vmatmul.msk.bf16.gmra.mxu1 %vm1147_vm3, %v3247_v2 }
 0x243   : > { %v1988_v14 = vld.sshfl [vmem:[#allocation1] sm:$0xff pattern:$0x73625140] }
 0x244   : > { %1990 = vst [vmem:[#allocation1] ss:$4 sm:$0xff] %v2835_v18  ;;  %v3349_v18 = vpop.f32.mrf.mxu1 }
 0x245   : > { %1991 = vst [vmem:[#allocation1 + $0x1] ss:$4 sm:$0xff] %v2852_v63  ;;  %v3352_v63 = vpop.f32.mrf.mxu3 }
 0x246   : > { %1992 = vst [vmem:[#allocation1 + $0x2] ss:$4 sm:$0xff] %v2861_v23 }
 0x247   : > { %v1847_v61 = vld.sshfl [vmem:[#allocation1 + $0x20] sm:$0xff pattern:$0x73625140]  ;;  %1993 = vst [vmem:[#allocation1 + $0x3] ss:$4 sm:$0xff] %v2875_v58 }
 0x248   : > { %1857 = vst [vmem:[#allocation1 + $0x20] ss:$4 sm:$0xff] %v3646_v6  ;;  %v2200_v6 = vld [vmem:[%s3541_s4 + $0x78] sm:$0xff] }
 0x249   : > { %1859 = vst [vmem:[#allocation1 + $0x21] ss:$4 sm:$0xff] %v3647_v19  ;;  %2228 = vmatpush.msra.mxu3 %v2200_v6 }
 0x24a   : > { %1861 = vst [vmem:[#allocation1 + $0x22] ss:$4 sm:$0xff] %v3051_v49 }
 0x24b   : > { %1863 = vst [vmem:[#allocation1 + $0x23] ss:$4 sm:$0xff] %v3058_v60  ;;  %v3648_v60 = vld [vmem:[#allocation7_spill] sm:$0xff]  ;;  %2385 = vmatmul.msk.bf16.gmra.mxu3 %vm1147_vm3, %v3191_v5 }
 0x24c   : > { %v3357_v58 = vpop.f32.mrf.mxu1 }
 0x24d   : > { %v3362_v49 = vpop.f32.mrf.mxu3 }
 0x24e   : > { %v1998_v23 = vld.sshfl [vmem:[#allocation1] sm:$0xff pattern:$0x73625140] }
 0x24f   : > { %2000 = vst [vmem:[#allocation1] ss:$4 sm:$0xff] %v2943_v51 }
 0x250   : > { %2001 = vst [vmem:[#allocation1 + $0x1] ss:$4 sm:$0xff] %v2960_v28 }
 0x251   : > { %2002 = vst [vmem:[#allocation1 + $0x2] ss:$4 sm:$0xff] %v2969_v13 }
 0x252   : > { %v1865_v37 = vld.sshfl [vmem:[#allocation1 + $0x20] sm:$0xff pattern:$0x73625140]  ;;  %2406 = vmatmul.msk.bf16.gmra.mxu1 %vm1147_vm3, %v1829_v8  ;;  %2003 = vst [vmem:[#allocation1 + $0x3] ss:$4 sm:$0xff] %v2983_v57 }
 0x253   : > { %1971 = vst [vmem:[#allocation1 + $0x20] ss:$4 sm:$0xff] %v2675_v32 }
 0x254   : > { %1973 = vst [vmem:[#allocation1 + $0x21] ss:$4 sm:$0xff] %v2678_v36  ;;  %v3369_v51 = vpop.f32.mrf.mxu1 }
 0x255   : > { %1975 = vst [vmem:[#allocation1 + $0x22] ss:$4 sm:$0xff] %v3648_v60  ;;  %v3371_v13 = vpop.f32.mrf.mxu3 }
 0x256   : > { %1977 = vst [vmem:[#allocation1 + $0x23] ss:$4 sm:$0xff] %v2709_v9 }
 0x259   : > { %v2008_v47 = vld.sshfl [vmem:[#allocation1] sm:$0xff pattern:$0x73625140] }
 0x25b   : > { %2386 = vmatmul.msk.bf16.gmra.mxu3 %vm1147_vm3, %v3280_v62 }
 0x25c   : > { %v1188_v32 = vpop.f32.mrf.mxu1 }
 0x25d   : > { %v1979_v28 = vld.sshfl [vmem:[#allocation1 + $0x20] sm:$0xff pattern:$0x73625140]  ;;  %v3380_v36 = vpop.f32.mrf.mxu3  ;;  %v1312_v57 = vpop.f32.mrf.mxu2 }
 0x25e   : > { %2420 = vmatmul.msk.bf16.gmra.mxu2 %vm1147_vm3, %v1979_v28  ;;  %1984 = vst [vmem:[#allocation1 + $0x20] ss:$4 sm:$0xff] %v2783_v34  ;;  %v1313_v20 = vadd.f32 %v1312_v57, %v1188_v32  ;;  %v3438_v57 = vld [vmem:[%s3540_s3] sm:$0xff] }
 0x25f   : > { %1985 = vst [vmem:[#allocation1 + $0x21] ss:$4 sm:$0xff] %v2786_v46 }
 0x260   : > { %1986 = vst [vmem:[#allocation1 + $0x22] ss:$4 sm:$0xff] %v2814_v50 }
 0x261   : > { %1987 = vst [vmem:[#allocation1 + $0x23] ss:$4 sm:$0xff] %v2817_v45 }
 0x262   : > { %2407 = vmatmul.msk.bf16.gmra.mxu1 %vm1147_vm3, %v3268_v26  ;;  %v1297_v26 = vpop.f32.mrf.mxu0 }
 0x264   : > { %v3388_v34 = vpop.f32.mrf.mxu1 }
 0x265   : > { %v3391_v46 = vpop.f32.mrf.mxu3  ;;  %v3393_v50 = vpop.f32.mrf.mxu2 }
 0x268   : > { %v1989_v9 = vld.sshfl [vmem:[#allocation1 + $0x20] sm:$0xff pattern:$0x73625140] }
 0x269   : > { %1994 = vst [vmem:[#allocation1 + $0x20] ss:$4 sm:$0xff] %v2889_v43 }
 0x26a   : > { %1995 = vst [vmem:[#allocation1 + $0x21] ss:$4 sm:$0xff] %v2894_v33  ;;  %v1299_v12 = vpop.f32.mrf.mxu0 }
 0x26b   : > { %1996 = vst [vmem:[#allocation1 + $0x22] ss:$4 sm:$0xff] %v2922_v27  ;;  %v1300_v55 = vadd.f32 %v1299_v12, %v3316_v10  ;;  %v2197_v12 = vld [vmem:[%s3541_s4 + $0x60] sm:$0xff] }
 0x26c   : > { %1997 = vst [vmem:[#allocation1 + $0x23] ss:$4 sm:$0xff] %v3611_v24  ;;  %v3398_v43 = vpop.f32.mrf.mxu1 }
 0x26d   : > { %v1568_v33 = vpop.f32.mrf.mxu3  ;;  %v3402_v27 = vpop.f32.mrf.mxu2 }
 0x26e   : > { %2421 = vmatmul.msk.bf16.gmra.mxu2 %vm1147_vm3, %v1988_v14 }
 0x272   : > { %2408 = vmatmul.msk.bf16.gmra.mxu1 %vm1147_vm3, %v1847_v61  ;;  %v1302_v7 = vpop.f32.mrf.mxu0 }
 0x273   : > { %v1999_v45 = vld.sshfl [vmem:[#allocation1 + $0x20] sm:$0xff pattern:$0x73625140]  ;;  %v1303_v4 = vadd.f32 %v1302_v7, %v3331_v30 }
 0x274   : > { %2004 = vst [vmem:[#allocation1 + $0x20] ss:$4 sm:$0xff] %v3006_v52  ;;  %v1195_v5 = vpop.f32.mrf.mxu1  ;;  %v1298_v52 = vadd.f32 %v1297_v26, %v3297_v56 }
 0x275   : > { %2005 = vst [vmem:[#allocation1 + $0x21] ss:$4 sm:$0xff] %v3010_v15  ;;  %v1319_v24 = vpop.f32.mrf.mxu2  ;;  %v1570_v2 = vpop.f32.mrf.mxu3 }
 0x276   : > { %2006 = vst [vmem:[#allocation1 + $0x22] ss:$4 sm:$0xff] %v3036_v16  ;;  %v3405_v53 = vadd.f32 %v1319_v24, %v1195_v5  ;;  %v1608_v16 = vadd.f32 %v1568_v33, %v1298_v52  ;;  %v1609_v54 = vadd.f32 %v1570_v2, %v1300_v55  ;;  %v2199_v33 = vld [vmem:[%s3541_s4 + $0x70] sm:$0xff] }
 0x277   : > { %2007 = vst [vmem:[#allocation1 + $0x23] ss:$4 sm:$0xff] %v3040_v59  ;;  %2229 = vmatpush.msra.mxu3 %v2199_v33 }
 0x27a   : > { %v1304_v8 = vpop.f32.mrf.mxu0 }
 0x27b   : > { %v1305_v21 = vadd.f32 %v1304_v8, %v3349_v18 }
 0x27d   : > { %v3410_v15 = vpop.f32.mrf.mxu2 }
 0x27e   : > { %2422 = vmatmul.msk.bf16.gmra.mxu2 %vm1147_vm3, %v1989_v9  ;;  %v1573_v62 = vpop.f32.mrf.mxu3 }
 0x27f   : > { %v1610_v0 = vadd.f32 %v1573_v62, %v1303_v4 }
 0x282   : > { %2409 = vmatmul.msk.bf16.gmra.mxu1 %vm1147_vm3, %v3291_v39  ;;  %v1307_v61 = vpop.f32.mrf.mxu0 }
 0x283   : > { %v1308_v30 = vadd.f32 %v1307_v61, %v3357_v58  ;;  %v3443_v58 = vld [vmem:[%s3540_s3 + $0x8] sm:$0xff] }
 0x285   : > { %v3414_v3 = vpop.f32.mrf.mxu2 }
 0x286   : > { %v1575_v22 = vpop.f32.mrf.mxu3 }
 0x287   : > { %v1611_v14 = vadd.f32 %v1575_v22, %v1305_v21 }
 0x28a   : > { %v1903_v59 = vpop.f32.mrf.mxu1  ;;  %v1309_v18 = vpop.f32.mrf.mxu0 }
 0x28b   : > { %v1943_v17 = vadd.f32 %v1903_v59, %v1608_v16  ;;  %v1310_v9 = vadd.f32 %v1309_v18, %v3369_v51 }
 0x28d   : > { %v3417_v56 = vpop.f32.mrf.mxu2 }
 0x28e   : > { %2423 = vmatmul.msk.bf16.gmra.mxu2 %vm1147_vm3, %v1998_v23  ;;  %v1578_v29 = vpop.f32.mrf.mxu3  ;;  %v2009_v23 = vld.sshfl [vmem:[#allocation1 + $0x20] sm:$0xff pattern:$0x73625140] }
 0x28f   : > { %v1612_v60 = vadd.f32 %v1578_v29, %v1308_v30 }
 0x292   : > { %2410 = vmatmul.msk.bf16.gmra.mxu1 %vm1147_vm3, %v1865_v37  ;;  %v1905_v39 = vpop.f32.mrf.mxu1 }
 0x293   : > { %v1944_v25 = vadd.f32 %v1905_v39, %v1609_v54 }
 0x295   : > { %v3420_v42 = vpop.f32.mrf.mxu2 }
 0x296   : > { %v1580_v11 = vpop.f32.mrf.mxu3 }
 0x297   : > { %v1613_v24 = vadd.f32 %v1580_v11, %v1310_v9 }
 0x29d   : > { %v3422_v44 = vpop.f32.mrf.mxu2 }
 0x29e   : > { %2424 = vmatmul.msk.bf16.gmra.mxu2 %vm1147_vm3, %v1999_v45  ;;  %v1583_v48 = vpop.f32.mrf.mxu3 }
 0x29f   : > { %v1614_v10 = vadd.f32 %v1583_v48, %v1313_v20  ;;  %v2196_v48 = vld [vmem:[%s3541_s4 + $0x58] sm:$0xff] }
 0x2a5   : > { %v3426_v38 = vpop.f32.mrf.mxu2 }
 0x2a6   : > { %v1585_v21 = vpop.f32.mrf.mxu3 }
 0x2ae   : > { %2425 = vmatmul.msk.bf16.gmra.mxu2 %vm1147_vm3, %v2008_v47  ;;  %v1588_v33 = vpop.f32.mrf.mxu3 }
 0x2af   : > { %v1908_v31 = vpop.f32.mrf.mxu1 }
 0x2b0   : > { %v1945_v35 = vadd.f32 %v1908_v31, %v1610_v0 }
 0x2b7   : > { %v1910_v40 = vpop.f32.mrf.mxu1 }
 0x2b8   : > { %v1946_v41 = vadd.f32 %v1910_v40, %v1611_v14 }
 0x2bc   : > { %v2047_v19 = vpop.f32.mrf.mxu2 }
 0x2bd   : > { %v2087_v37 = vadd.f32 %v2047_v19, %v1943_v17  ;;  %v2198_v17 = vld [vmem:[%s3541_s4 + $0x68] sm:$0xff] }
 0x2be   : > { %2426 = vmatmul.msk.bf16.gmra.mxu2 %vm1147_vm3, %v2009_v23  ;;  %2230 = vmatpush.msra.mxu3 %v2198_v17 }
 0x2bf   : > { %v1913_v28 = vpop.f32.mrf.mxu1  ;;  %v2105_v51 = vadd.f32 %v3438_v57, %v2087_v37 }
 0x2c0   : > { %v1947_v32 = vadd.f32 %v1913_v28, %v1612_v60  ;;  %2231 = vmatpush.msra.mxu3 %v2197_v12 }
 0x2c2   : > { %2232 = vmatpush.msra.mxu3 %v2196_v48 }
 0x2c4   : > { %v2049_v45 = vpop.f32.mrf.mxu2 }
 0x2c5   : > { %v2088_v5 = vadd.f32 %v2049_v45, %v1944_v25  ;;  %v2193_v45 = vld [vmem:[%s3541_s4 + $0x40] sm:$0xff] }
 0x2c7   : > { %v1915_v2 = vpop.f32.mrf.mxu1  ;;  %v2106_v26 = vadd.f32 %v3443_v58, %v2088_v5 }
 0x2c8   : > { %v1948_v52 = vadd.f32 %v1915_v2, %v1613_v24 }
 0x2c9   : > { %v2121_v16 = vmax.f32 %v2105_v51, %v2106_v26 }
 0x2cb   : > { %v2122_v22 = vrot.slane %v2121_v16, 4 }
 0x2cd   : > { %v2123_v39 = vmax.f32 %v2121_v16, %v2122_v22 }
 0x2cf   : > { %v1918_v62 = vpop.f32.mrf.mxu1  ;;  %v2124_v11 = vrot.slane %v2123_v39, 2 }
 0x2d0   : > { %v1949_v59 = vadd.f32 %v1918_v62, %v1614_v10  ;;  %v2195_v10 = vld [vmem:[%s3541_s4 + $0x50] sm:$0xff]  ;;  %v1315_v62 = vadd.f32 %v3393_v50, %v3388_v34 }
 0x2d1   : > { %2233 = vmatpush.msra.mxu3 %v2195_v10  ;;  %v2125_v8 = vmax.f32 %v2123_v39, %v2124_v11  ;;  %v2191_v34 = vld [vmem:[%s3541_s4 + $0x30] sm:$0xff] }
 0x2d2   : > { %v1615_v12 = vadd.f32 %v1585_v21, %v1315_v62 }
 0x2d3   : > { %v2126_v14 = vrot.slane %v2125_v8, 1 }
 0x2d5   : > { %v2127_v6 = vmax.f32 %v2125_v8, %v2126_v14 }
 0x2d7   : > { %v1920_v40 = vpop.f32.mrf.mxu1  ;;  %v2177_v60 = vmax.f32 %v2127_v6, 0.0 }
 0x2d8   : > { %v1950_v22 = vadd.f32 %v1920_v40, %v1615_v12 }
 0x2df   : > { %v1923_v2 = vpop.f32.mrf.mxu1 }
 0x2e1   : > { %v2052_v55 = vpop.f32.mrf.mxu2 }
 0x2e2   : > { %v2089_v54 = vadd.f32 %v2052_v55, %v1945_v35 }
 0x2e4   : > { %v2107_v7 = vadd.f32 %v3438_v57, %v2089_v54  ;;  %v1590_v54 = vpop.f32.mrf.mxu3 }
 0x2e5   : > { %v1617_v40 = vadd.f32 %v1590_v54, %v3405_v53  ;;  %v2189_v53 = vld [vmem:[%s3541_s4 + $0x20] sm:$0xff] }
 0x2e9   : > { %v2054_v25 = vpop.f32.mrf.mxu2 }
 0x2ea   : > { %v2090_v29 = vadd.f32 %v2054_v25, %v1946_v41  ;;  %v1925_v25 = vpop.f32.mrf.mxu1 }
 0x2ec   : > { %v2108_v20 = vadd.f32 %v3443_v58, %v2090_v29 }
 0x2ee   : > { %v2128_v4 = vmax.f32 %v2107_v7, %v2108_v20 }
 0x2f0   : > { %v2129_v47 = vrot.slane %v2128_v4, 4 }
 0x2f1   : > { %v2057_v0 = vpop.f32.mrf.mxu2 }
 0x2f2   : > { %v2130_v31 = vmax.f32 %v2128_v4, %v2129_v47  ;;  %v2091_v35 = vadd.f32 %v2057_v0, %v1947_v32  ;;  %v2194_v32 = vld [vmem:[%s3541_s4 + $0x48] sm:$0xff]  ;;  %v1593_v47 = vpop.f32.mrf.mxu3  ;;  %v1928_v21 = vpop.f32.mrf.mxu1 }
 0x2f3   : > { %2234 = vmatpush.msra.mxu3 %v2194_v32 }
 0x2f4   : > { %v2131_v61 = vrot.slane %v2130_v31, 2  ;;  %v2109_v18 = vadd.f32 %v3438_v57, %v2091_v35 }
 0x2f5   : > { %2235 = vmatpush.msra.mxu3 %v2193_v45 }
 0x2f6   : > { %v2132_v41 = vmax.f32 %v2130_v31, %v2131_v61  ;;  %v1318_v31 = vadd.f32 %v3402_v27, %v3398_v43  ;;  %v2190_v27 = vld [vmem:[%s3541_s4 + $0x28] sm:$0xff] }
 0x2f8   : > { %v2133_v30 = vrot.slane %v2132_v41, 1  ;;  %v1616_v14 = vadd.f32 %v1588_v33, %v1318_v31  ;;  %v1330_v31 = vadd.f32 %v3420_v42, %v3371_v13 }
 0x2f9   : > { %v2059_v19 = vpop.f32.mrf.mxu2 }
 0x2fa   : > { %v2134_v23 = vmax.f32 %v2132_v41, %v2133_v30  ;;  %v2092_v37 = vadd.f32 %v2059_v19, %v1948_v52  ;;  %v1951_v41 = vadd.f32 %v1923_v2, %v1616_v14  ;;  %v1952_v30 = vadd.f32 %v1925_v25, %v1617_v40  ;;  %v1930_v45 = vpop.f32.mrf.mxu1 }
 0x2fc   : > { %v2178_v28 = vmax.f32 %v2134_v23, 0.0  ;;  %v2110_v9 = vadd.f32 %v3443_v58, %v2092_v37 }
 0x2fe   : > { %v2214_v5 = vsel %vm2213_vm15, %v2178_v28, %v2177_v60  ;;  %v2135_v24 = vmax.f32 %v2109_v18, %v2110_v9  ;;  %v1595_v18 = vpop.f32.mrf.mxu3 }
 0x300   : > { %v2136_v51 = vrot.slane %v2135_v24, 4 }
 0x301   : > { %v2062_v26 = vpop.f32.mrf.mxu2 }
 0x302   : > { %v2137_v52 = vmax.f32 %v2135_v24, %v2136_v51  ;;  %v2093_v16 = vadd.f32 %v2062_v26, %v1949_v59  ;;  %v2192_v59 = vld [vmem:[%s3541_s4 + $0x38] sm:$0xff]  ;;  %v1323_v51 = vadd.f32 %v3410_v15, %v3333_v1 }
 0x303   : > { %2236 = vmatpush.msra.mxu3 %v2192_v59  ;;  %v2188_v1 = vld [vmem:[%s3541_s4 + $0x18] sm:$0xff] }
 0x304   : > { %v2138_v17 = vrot.slane %v2137_v52, 2  ;;  %v2111_v48 = vadd.f32 %v3438_v57, %v2093_v16  ;;  %v1618_v16 = vadd.f32 %v1593_v47, %v1323_v51  ;;  %v1328_v47 = vadd.f32 %v3417_v56, %v3362_v49 }
 0x305   : > { %2237 = vmatpush.msra.mxu3 %v2191_v34 }
 0x306   : > { %v2139_v55 = vmax.f32 %v2137_v52, %v2138_v17  ;;  %v1325_v52 = vadd.f32 %v3414_v3, %v3352_v63  ;;  %v1598_v17 = vpop.f32.mrf.mxu3  ;;  %v2187_v63 = vld [vmem:[%s3541_s4 + $0x10] sm:$0xff] }
 0x307   : > { %2238 = vmatpush.msra.mxu3 %v2190_v27 }
 0x308   : > { %v2140_v39 = vrot.slane %v2139_v55, 1  ;;  %v1619_v12 = vadd.f32 %v1595_v18, %v1325_v52 }
 0x309   : > { %v2064_v29 = vpop.f32.mrf.mxu2  ;;  %2239 = vmatpush.msra.mxu3 %v2189_v53  ;;  %v1333_v53 = vadd.f32 %v3422_v44, %v3380_v36 }
 0x30a   : > { %v2141_v11 = vmax.f32 %v2139_v55, %v2140_v39  ;;  %v2094_v7 = vadd.f32 %v2064_v29, %v1950_v22  ;;  %v1953_v55 = vadd.f32 %v1928_v21, %v1618_v16  ;;  %v1933_v22 = vpop.f32.mrf.mxu1  ;;  %v1954_v39 = vadd.f32 %v1930_v45, %v1619_v12 }
 0x30b   : > { %2240 = vmatpush.msra.mxu3 %v2188_v1 }
 0x30c   : > { %v2179_v20 = vmax.f32 %v2141_v11, 0.0  ;;  %v2112_v10 = vadd.f32 %v3443_v58, %v2094_v7 }
 0x30d   : > { %2241 = vmatpush.msra.mxu3 %v2187_v63 }
 0x30e   : > { %v2142_v50 = vmax.f32 %v2111_v48, %v2112_v10  ;;  %v2216_v4 = vsel %vm1338_vm8, %v2179_v20, %v2214_v5  ;;  %v1600_v34 = vpop.f32.mrf.mxu3 }
 0x30f   : > { %v1621_v14 = vadd.f32 %v1600_v34, %v1330_v31 }
 0x310   : > { %v2143_v8 = vrot.slane %v2142_v50, 4 }
 0x311   : > { %v2067_v0 = vpop.f32.mrf.mxu2 }
 0x312   : > { %v2144_v35 = vmax.f32 %v2142_v50, %v2143_v8  ;;  %v2095_v23 = vadd.f32 %v2067_v0, %v1951_v41  ;;  %v2186_v41 = vld [vmem:[%s3541_s4 + $0x8] sm:$0xff] }
 0x313   : > { %2242 = vmatpush.msra.mxu3 %v2186_v41 }
 0x314   : > { %v2145_v61 = vrot.slane %v2144_v35, 2  ;;  %v2113_v32 = vadd.f32 %v3438_v57, %v2095_v23 }
 0x316   : > { %v2146_v6 = vmax.f32 %v2144_v35, %v2145_v61  ;;  %v1620_v35 = vadd.f32 %v1598_v17, %v1328_v47 }
 0x318   : > { %v2147_v19 = vrot.slane %v2146_v6, 1  ;;  %v1955_v61 = vadd.f32 %v1933_v22, %v1620_v35 }
 0x319   : > { %v2069_v37 = vpop.f32.mrf.mxu2 }
 0x31a   : > { %v2148_v60 = vmax.f32 %v2146_v6, %v2147_v19  ;;  %v2096_v28 = vadd.f32 %v2069_v37, %v1952_v30  ;;  %v2185_v6 = vld [vmem:[%s3541_s4] sm:$0xff]  ;;  %v1603_v19 = vpop.f32.mrf.mxu3 }
 0x31b   : > { %2243 = vmatpush.msra.mxu3 %v2185_v6 }
 0x31c   : > { %v2180_v9 = vmax.f32 %v2148_v60, 0.0  ;;  %v2114_v43 = vadd.f32 %v3443_v58, %v2096_v28 }
 0x31e   : > { %v2149_v33 = vmax.f32 %v2113_v32, %v2114_v43  ;;  %v2218_v5 = vsel %vm2217_vm0, %v2180_v9, %v2216_v4  ;;  %v1935_v4 = vpop.f32.mrf.mxu1 }
 0x31f   : > { %v1956_v30 = vadd.f32 %v1935_v4, %v1621_v14 }
 0x320   : > { %v2150_v24 = vrot.slane %v2149_v33, 4 }
 0x321   : > { %v2072_v2 = vpop.f32.mrf.mxu2 }
 0x322   : > { %v2151_v26 = vmax.f32 %v2149_v33, %v2150_v24  ;;  %v2097_v29 = vadd.f32 %v2072_v2, %v1953_v55  ;;  %v1605_v33 = vpop.f32.mrf.mxu3  ;;  %v1622_v24 = vadd.f32 %v1603_v19, %v1333_v53 }
 0x324   : > { %v2152_v62 = vrot.slane %v2151_v26, 2  ;;  %v2115_v3 = vadd.f32 %v3438_v57, %v2097_v29 }
 0x326   : > { %v2153_v54 = vmax.f32 %v2151_v26, %v2152_v62  ;;  %v1938_v37 = vpop.f32.mrf.mxu1 }
 0x327   : > { %v1957_v52 = vadd.f32 %v1938_v37, %v1622_v24 }
 0x328   : > { %v2154_v25 = vrot.slane %v2153_v54, 1 }
 0x329   : > { %v2074_v11 = vpop.f32.mrf.mxu2 }
 0x32a   : > { %v2155_v7 = vmax.f32 %v2153_v54, %v2154_v25  ;;  %v2098_v20 = vadd.f32 %v2074_v11, %v1954_v39 }
 0x32c   : > { %v2181_v15 = vmax.f32 %v2155_v7, 0.0  ;;  %v2116_v48 = vadd.f32 %v3443_v58, %v2098_v20 }
 0x32e   : > { %v2156_v10 = vmax.f32 %v2115_v3, %v2116_v48  ;;  %v2220_v59 = vsel %vm1340_vm11, %v2181_v15, %v2218_v5  ;;  %v1335_v5 = vadd.f32 %v3426_v38, %v3391_v46  ;;  %v1940_v51 = vpop.f32.mrf.mxu1 }
 0x330   : > { %v2157_v50 = vrot.slane %v2156_v10, 4  ;;  %v1623_v26 = vadd.f32 %v1605_v33, %v1335_v5 }
 0x331   : > { %v2077_v8 = vpop.f32.mrf.mxu2 }
 0x332   : > { %v2158_v0 = vmax.f32 %v2156_v10, %v2157_v50  ;;  %v2099_v56 = vadd.f32 %v2077_v8, %v1955_v61  ;;  %v1958_v62 = vadd.f32 %v1940_v51, %v1623_v26 }
 0x334   : > { %v2159_v21 = vrot.slane %v2158_v0, 2  ;;  %v2117_v28 = vadd.f32 %v3438_v57, %v2099_v56 }
 0x336   : > { %v2160_v40 = vmax.f32 %v2158_v0, %v2159_v21 }
 0x338   : > { %v2161_v49 = vrot.slane %v2160_v40, 1 }
 0x339   : > { %v2079_v23 = vpop.f32.mrf.mxu2 }
 0x33a   : > { %v2162_v13 = vmax.f32 %v2160_v40, %v2161_v49  ;;  %v2100_v42 = vadd.f32 %v2079_v23, %v1956_v30 }
 0x33c   : > { %v2182_v60 = vmax.f32 %v2162_v13, 0.0  ;;  %v2118_v18 = vadd.f32 %v3443_v58, %v2100_v42 }
 0x33e   : > { %v2163_v9 = vmax.f32 %v2117_v28, %v2118_v18  ;;  %v2222_v32 = vsel %vm2221_vm1, %v2182_v60, %v2220_v59 }
 0x340   : > { %v2164_v43 = vrot.slane %v2163_v9, 4 }
 0x341   : > { %v2082_v27 = vpop.f32.mrf.mxu2 }
 0x342   : > { %v2165_v45 = vmax.f32 %v2163_v9, %v2164_v43  ;;  %v2101_v12 = vadd.f32 %v2082_v27, %v1957_v52 }
 0x344   : > { %v2166_v2 = vrot.slane %v2165_v45, 2  ;;  %v2119_v36 = vadd.f32 %v3438_v57, %v2101_v12  ;;  %v2459_v57 = vld [vmem:[%s3542_s5] ss:$0 sm:$0xff] }
 0x346   : > { %v2167_v16 = vmax.f32 %v2165_v45, %v2166_v2 }
 0x348   : > { %v2168_v17 = vrot.slane %v2167_v16, 1 }
 0x349   : > { %v2084_v55 = vpop.f32.mrf.mxu2 }
 0x34a   : > { %v2169_v54 = vmax.f32 %v2167_v16, %v2168_v17  ;;  %v2102_v22 = vadd.f32 %v2084_v55, %v1958_v62 }
 0x34c   : > { %v2120_v44 = vadd.f32 %v3443_v58, %v2102_v22  ;;  %v2183_v39 = vmax.f32 %v2169_v54, 0.0 }
 0x34e   : > { %v2170_v46 = vmax.f32 %v2119_v36, %v2120_v44  ;;  %v2224_v38 = vsel %vm1342_vm13, %v2183_v39, %v2222_v32 }
 0x350   : > { %v2171_v25 = vrot.slane %v2170_v46, 4 }
 0x352   : > { %v2172_v29 = vmax.f32 %v2170_v46, %v2171_v25 }
 0x354   : > { %v2173_v11 = vrot.slane %v2172_v29, 2 }
 0x356   : > { %v2174_v7 = vmax.f32 %v2172_v29, %v2173_v11 }
 0x358   : > { %v2175_v20 = vrot.slane %v2174_v7, 1 }
 0x35a   : > { %v2176_v1 = vmax.f32 %v2174_v7, %v2175_v20 }
 0x35c   : > { %v2184_v63 = vmax.f32 %v2176_v1, 0.0 }
 0x35e   : > { %v2226_v15 = vsel %vm2225_vm2, %v2184_v63, %v2224_v38 }
 0x35f   : > { %2244 = vmatmul.f32.vlgmr.msra.gmra.mxu3 %v2226_v15 }
 0x3e2   : > { %v2245_v58 = vpop.f32.mrf.mxu3 }
 0x3e3   : > { %v2246_v3 = vadd.f32 %v2459_v57, %v2245_v58 }
 0x3e5   : > { %2248 = vst [vmem:[%s251_s7] sm:$0xff] %v2246_v3 }
 0x3e6 PF: > { %s16_s21 = sadd.s32 1, %s2466_s21  }
 0x3e7   : > { %p13_p5 = scmp.ge.s32.totalorder %s16_s21, 4  }
 0x3e9   :  { %15 = sbr.rel (!%p13_p5) target bundleno = 1 (0x1), region = 109 }

</bundles_post_ra>
